<compile_context>
chip_gen: v7x
topology: tpu7x:2x2x1
jax: 0.10.0
libtpu: 0.0.40
codegen_flags: <defaults>
</compile_context>

<pallas_src>
import math
from functools import partial

import jax
import jax.numpy as jnp
from jax.experimental import pallas as pl
from jax.experimental.pallas import tpu as pltpu


def _layer_norm(x, gamma, beta, eps, n):
    # Matches the PyTorch module: (x - mean) / (std + eps), unbiased std.
    mean = jnp.mean(x, axis=-1, keepdims=True)
    xc = x - mean
    var = jnp.sum(xc * xc, axis=-1, keepdims=True) * (1.0 / (n - 1))
    inv = pl.reciprocal(jnp.sqrt(var) + eps, approx=False)
    return gamma * (xc * inv) + beta


def _encoder_layer_kernel(x_ref, mask_ref,
                          ln1g_ref, ln1b_ref,
                          wq_ref, bq_ref, wk_ref, bk_ref,
                          wv_ref, bv_ref, wo_ref, bo_ref,
                          ln2g_ref, ln2b_ref,
                          w1_ref, b1_ref, w2_ref, b2_ref,
                          o_ref,
                          *, n_heads, dk, block_b, seq_len, eps):
    D = n_heads * dk
    L = seq_len
    M = block_b * L
    G = block_b * n_heads
    bf16 = jnp.bfloat16

    # Flatten (block_b, L, D) -> (M, D): projections / LN / MLP run on one tall
    # slab (amortizes per-step overhead, bigger MXU M dimension).
    x = x_ref[...].reshape(M, D)                               # f32 residual

    # ---------------- resnorm1: LayerNorm -> self-attention -> residual -----
    h = _layer_norm(x, ln1g_ref[...], ln1b_ref[...], eps, D)
    hb = h.astype(bf16)                                        # bf16 MXU input

    # 1/sqrt(dk) is already folded into wq/bq (wrapper side).
    q = jnp.dot(hb, wq_ref[...], preferred_element_type=jnp.float32) + bq_ref[...]
    k = jnp.dot(hb, wk_ref[...], preferred_element_type=jnp.float32) + bk_ref[...]
    v = jnp.dot(hb, wv_ref[...], preferred_element_type=jnp.float32) + bv_ref[...]

    def to_heads(t):
        # (M, D) -> (block_b*H, L, dk): heads become the dot_general batch dim,
        # so score and P@V are single batched MXU ops (no sub-lane slicing).
        t4 = t.reshape(block_b, L, n_heads, dk)
        return jnp.transpose(t4, (0, 2, 1, 3)).reshape(G, L, dk)

    qh = to_heads(q).astype(bf16)   # f32 flat slabs die right after restructure
    kh = to_heads(k).astype(bf16)
    vh = to_heads(v).astype(bf16)

    # Scores for all (batch, head) pairs in one batched matmul.
    s = jnp.einsum("gqd,gkd->gqk", qh, kh, preferred_element_type=jnp.float32)
    s = s.reshape(block_b, n_heads, L, L)

    # Mask select (no materialized additive-bias slab): mask==0 -> -1e9.
    keep = mask_ref[...].astype(jnp.float32) != 0.0            # (block_b, L, L)
    s = jnp.where(keep[:, None, :, :], s, -1000000000.0)

    s_max = jnp.max(s, axis=-1, keepdims=True)
    e = jnp.exp(s - s_max)
    denom = jnp.sum(e, axis=-1, keepdims=True)
    p = (e * pl.reciprocal(denom, approx=True)).astype(bf16)
    p = p.reshape(G, L, L)

    o = jnp.einsum("gqk,gkd->gqd", p, vh, preferred_element_type=jnp.float32)
    o = jnp.transpose(o.reshape(block_b, n_heads, L, dk), (0, 2, 1, 3))
    concat = o.reshape(M, D).astype(bf16)                      # lane-dense slab

    attn_out = jnp.dot(concat, wo_ref[...],
                       preferred_element_type=jnp.float32) + bo_ref[...]
    x1 = x + attn_out                                          # dropout == id

    # ---------------- resnorm2: LayerNorm -> MLP -> residual ----------------
    h2 = _layer_norm(x1, ln2g_ref[...], ln2b_ref[...], eps, D)
    h2b = h2.astype(bf16)
    f1 = jnp.dot(h2b, w1_ref[...], preferred_element_type=jnp.float32) + b1_ref[...]
    f1 = jnp.maximum(f1, 0.0).astype(bf16)
    f2 = jnp.dot(f1, w2_ref[...], preferred_element_type=jnp.float32) + b2_ref[...]
    out = x1 + f2                                              # dropout == id

    o_ref[...] = out.reshape(block_b, L, D).astype(o_ref.dtype)


def encoder_layer(x, mask, params, *, n_heads, block_b=1, eps=1e-6):
    """Fused EncoderLayer forward.

    params holds PyTorch-style weights: wq/wk/wv/wo (D,D), w1 (F,D), w2 (D,F),
    their biases, and ln{1,2}_{g,b}. Weights are transposed + cast to bf16 here
    (plain-JAX glue) so the kernel computes x @ W_t + b on the MXU; 1/sqrt(dk)
    is folded into wq/bq (weight-side folding, algebraically exact).
    """
    B, L, D = x.shape
    assert D % n_heads == 0 and B % block_b == 0
    dk = D // n_heads
    ffd = params["w1"].shape[0]

    bf = jnp.bfloat16
    f32 = jnp.float32
    inv_sqrt_dk = 1.0 / math.sqrt(dk)

    wq_t = (params["wq"].T * inv_sqrt_dk).astype(bf)   # scale folded into WQ
    bq = (params["bq"] * inv_sqrt_dk).reshape(1, D).astype(f32)
    wk_t = params["wk"].T.astype(bf)
    wv_t = params["wv"].T.astype(bf)
    wo_t = params["wo"].T.astype(bf)
    w1_t = params["w1"].T.astype(bf)                   # (D, F)
    w2_t = params["w2"].T.astype(bf)                   # (F, D)
    bk = params["bk"].reshape(1, D).astype(f32)
    bv = params["bv"].reshape(1, D).astype(f32)
    bo = params["bo"].reshape(1, D).astype(f32)
    b1 = params["b1"].reshape(1, ffd).astype(f32)
    b2 = params["b2"].reshape(1, D).astype(f32)
    ln1g = params["ln1_g"].reshape(1, D).astype(f32)
    ln1b = params["ln1_b"].reshape(1, D).astype(f32)
    ln2g = params["ln2_g"].reshape(1, D).astype(f32)
    ln2b = params["ln2_b"].reshape(1, D).astype(f32)

    # int8 mask: 4x less mask DMA/VMEM than f32.
    mask_i8 = (mask != 0).astype(jnp.int8)

    kernel = partial(_encoder_layer_kernel, n_heads=n_heads, dk=dk,
                     block_b=block_b, seq_len=L, eps=eps)

    const = lambda shape: pl.BlockSpec(shape, lambda b: (0, 0))

    # VMEM limit sized from actual tiles (32 MiB floor), not a hard-coded
    # default: bf16 weights + f32/bf16 activation slabs + score/prob tiles,
    # x2 for double-buffering/headroom.
    M = block_b * L
    w_bytes = 2 * (4 * D * D + 2 * D * ffd)
    act_bytes = 4 * M * (8 * D + 2 * ffd)
    attn_bytes = 4 * block_b * n_heads * L * (3 * L + 2 * dk)
    vmem_limit = int(min(max(2 * (w_bytes + act_bytes + attn_bytes) + (4 << 20),
                             32 << 20), 100 << 20))

    return pl.pallas_call(
        kernel,
        out_shape=jax.ShapeDtypeStruct((B, L, D), x.dtype),
        grid_spec=pltpu.PrefetchScalarGridSpec(
            num_scalar_prefetch=0,
            grid=(B // block_b,),
            in_specs=[
                pl.BlockSpec((block_b, L, D), lambda b: (b, 0, 0)),   # x
                pl.BlockSpec((block_b, L, L), lambda b: (b, 0, 0)),   # mask i8
                const((1, D)), const((1, D)),                         # ln1 g,b
                const((D, D)), const((1, D)),                         # wq, bq
                const((D, D)), const((1, D)),                         # wk, bk
                const((D, D)), const((1, D)),                         # wv, bv
                const((D, D)), const((1, D)),                         # wo, bo
                const((1, D)), const((1, D)),                         # ln2 g,b
                const((D, ffd)), const((1, ffd)),                     # w1, b1
                const((ffd, D)), const((1, D)),                       # w2, b2
            ],
            out_specs=pl.BlockSpec((block_b, L, D), lambda b: (b, 0, 0)),
        ),
        compiler_params=pltpu.CompilerParams(
            dimension_semantics=("parallel",),
            vmem_limit_bytes=vmem_limit),
    )(x, mask_i8, ln1g, ln1b, wq_t, bq, wk_t, bk, wv_t, bv, wo_t, bo,
      ln2g, ln2b, w1_t, b1, w2_t, b2)


def _reference(x, mask, params, n_heads, eps=1e-6):
    """Pure-JAX f32 reference mirroring the PyTorch EncoderLayer forward."""
    B, L, D = x.shape
    dk = D // n_heads

    def layer_norm(z, g, b):
        mean = jnp.mean(z, axis=-1, keepdims=True)
        std = jnp.std(z, axis=-1, keepdims=True, ddof=1)   # unbiased, like torch
        return g * (z - mean) / (std + eps) + b

    def lin(a, w, b):
        return a @ w.T + b

    h = layer_norm(x, params["ln1_g"], params["ln1_b"])
    Q = lin(h, params["wq"], params["bq"]).reshape(B, L, n_heads, dk).transpose(0, 2, 1, 3)
    K = lin(h, params["wk"], params["bk"]).reshape(B, L, n_heads, dk).transpose(0, 2, 1, 3)
    V = lin(h, params["wv"], params["bv"]).reshape(B, L, n_heads, dk).transpose(0, 2, 1, 3)
    T = jnp.einsum("bhqd,bhkd->bhqk", Q, K) / math.sqrt(dk)
    T = jnp.where(mask[:, None, :, :] == 0, -1000000000.0, T)
    T = jax.nn.softmax(T, axis=-1)
    attn = jnp.einsum("bhqk,bhkd->bhqd", T, V).transpose(0, 2, 1, 3).reshape(B, L, D)
    x = x + lin(attn, params["wo"], params["bo"])
    h2 = layer_norm(x, params["ln2_g"], params["ln2_b"])
    ff = lin(jnp.maximum(lin(h2, params["w1"], params["b1"]), 0.0),
             params["w2"], params["b2"])
    return x + ff


if __name__ == "__main__":
    B, L, D, H, FF = 2, 8, 32, 4, 64

    key = jax.random.PRNGKey(0)
    ks = jax.random.split(key, 18)
    s = 1.0 / math.sqrt(D)
    sf = 1.0 / math.sqrt(FF)
    params = {
        "ln1_g": 1.0 + 0.1 * jax.random.normal(ks[0], (D,), jnp.float32),
        "ln1_b": 0.1 * jax.random.normal(ks[1], (D,), jnp.float32),
        "wq": jax.random.uniform(ks[2], (D, D), jnp.float32, -s, s),
        "bq": jax.random.uniform(ks[3], (D,), jnp.float32, -s, s),
        "wk": jax.random.uniform(ks[4], (D, D), jnp.float32, -s, s),
        "bk": jax.random.uniform(ks[5], (D,), jnp.float32, -s, s),
        "wv": jax.random.uniform(ks[6], (D, D), jnp.float32, -s, s),
        "bv": jax.random.uniform(ks[7], (D,), jnp.float32, -s, s),
        "wo": jax.random.uniform(ks[8], (D, D), jnp.float32, -s, s),
        "bo": jax.random.uniform(ks[9], (D,), jnp.float32, -s, s),
        "ln2_g": 1.0 + 0.1 * jax.random.normal(ks[10], (D,), jnp.float32),
        "ln2_b": 0.1 * jax.random.normal(ks[11], (D,), jnp.float32),
        "w1": jax.random.uniform(ks[12], (FF, D), jnp.float32, -s, s),
        "b1": jax.random.uniform(ks[13], (FF,), jnp.float32, -s, s),
        "w2": jax.random.uniform(ks[14], (D, FF), jnp.float32, -sf, sf),
        "b2": jax.random.uniform(ks[15], (D,), jnp.float32, -sf, sf),
    }

    x = jax.random.normal(ks[16], (B, L, D), jnp.float32)
    # Binary mask (1 = attend, 0 = masked): mask out last two keys of batch 1.
    mask = jnp.ones((B, L, L), jnp.float32)
    mask = mask.at[1, :, -2:].set(0.0)

    # block_b=1 -> grid=(2,): >=2 "parallel" steps so a 2-TC chip (v7x) shards
    # the batch across both TensorCores.
    out = encoder_layer(x, mask, params, n_heads=H, block_b=1)
    out = jax.block_until_ready(out)

    ref = _reference(x, mask, params, H)
    assert out.shape == (B, L, D)
    # bf16 MXU inputs + approx softmax reciprocal -> looser tolerance than f32.
    assert jnp.allclose(out, ref, atol=5e-2, rtol=5e-2), (
        "mismatch vs reference: max abs err "
        f"{float(jnp.max(jnp.abs(out - ref)))}")

    print("KERNEL_OK")
</pallas_src>

<mosaic_0001>
module attributes {stable_mosaic.version = 11 : i64} {
  func.func @_encoder_layer_kernel(%arg0: i32, %arg1: memref<1x8x32xf32, #tpu.memory_space<vmem>>, %arg2: memref<1x8x8xi8, #tpu.memory_space<vmem>>, %arg3: memref<1x32xf32, #tpu.memory_space<vmem>>, %arg4: memref<1x32xf32, #tpu.memory_space<vmem>>, %arg5: memref<32x32xbf16, #tpu.memory_space<vmem>>, %arg6: memref<1x32xf32, #tpu.memory_space<vmem>>, %arg7: memref<32x32xbf16, #tpu.memory_space<vmem>>, %arg8: memref<1x32xf32, #tpu.memory_space<vmem>>, %arg9: memref<32x32xbf16, #tpu.memory_space<vmem>>, %arg10: memref<1x32xf32, #tpu.memory_space<vmem>>, %arg11: memref<32x32xbf16, #tpu.memory_space<vmem>>, %arg12: memref<1x32xf32, #tpu.memory_space<vmem>>, %arg13: memref<1x32xf32, #tpu.memory_space<vmem>>, %arg14: memref<1x32xf32, #tpu.memory_space<vmem>>, %arg15: memref<32x64xbf16, #tpu.memory_space<vmem>>, %arg16: memref<1x64xf32, #tpu.memory_space<vmem>>, %arg17: memref<64x32xbf16, #tpu.memory_space<vmem>>, %arg18: memref<1x32xf32, #tpu.memory_space<vmem>>, %arg19: memref<1x8x32xf32, #tpu.memory_space<vmem>>) attributes {dimension_semantics = [#tpu.dimension_semantics<parallel>], iteration_bounds = array<i64: 2>, scalar_prefetch = 0 : i64, scratch_operands = 0 : i64, tpu.core_type = #tpu.core_type<tc>, window_params = [{transform_indices = @transform_0, window_bounds = array<i64: 1, 8, 32>}, {transform_indices = @transform_1, window_bounds = array<i64: 1, 8, 8>}, {pipeline_mode = #tpu.pipeline_mode<synchronous>, transform_indices = @transform_2, window_bounds = array<i64: 1, 32>}, {pipeline_mode = #tpu.pipeline_mode<synchronous>, transform_indices = @transform_3, window_bounds = array<i64: 1, 32>}, {pipeline_mode = #tpu.pipeline_mode<synchronous>, transform_indices = @transform_4, window_bounds = array<i64: 32, 32>}, {pipeline_mode = #tpu.pipeline_mode<synchronous>, transform_indices = @transform_5, window_bounds = array<i64: 1, 32>}, {pipeline_mode = #tpu.pipeline_mode<synchronous>, transform_indices = @transform_6, window_bounds = array<i64: 32, 32>}, {pipeline_mode = #tpu.pipeline_mode<synchronous>, transform_indices = @transform_7, window_bounds = array<i64: 1, 32>}, {pipeline_mode = #tpu.pipeline_mode<synchronous>, transform_indices = @transform_8, window_bounds = array<i64: 32, 32>}, {pipeline_mode = #tpu.pipeline_mode<synchronous>, transform_indices = @transform_9, window_bounds = array<i64: 1, 32>}, {pipeline_mode = #tpu.pipeline_mode<synchronous>, transform_indices = @transform_10, window_bounds = array<i64: 32, 32>}, {pipeline_mode = #tpu.pipeline_mode<synchronous>, transform_indices = @transform_11, window_bounds = array<i64: 1, 32>}, {pipeline_mode = #tpu.pipeline_mode<synchronous>, transform_indices = @transform_12, window_bounds = array<i64: 1, 32>}, {pipeline_mode = #tpu.pipeline_mode<synchronous>, transform_indices = @transform_13, window_bounds = array<i64: 1, 32>}, {pipeline_mode = #tpu.pipeline_mode<synchronous>, transform_indices = @transform_14, window_bounds = array<i64: 32, 64>}, {pipeline_mode = #tpu.pipeline_mode<synchronous>, transform_indices = @transform_15, window_bounds = array<i64: 1, 64>}, {pipeline_mode = #tpu.pipeline_mode<synchronous>, transform_indices = @transform_16, window_bounds = array<i64: 64, 32>}, {pipeline_mode = #tpu.pipeline_mode<synchronous>, transform_indices = @transform_17, window_bounds = array<i64: 1, 32>}, {transform_indices = @transform_18, window_bounds = array<i64: 1, 8, 32>}]} {
    %c0 = arith.constant 0 : index
    %c0_0 = arith.constant 0 : index
    %c0_1 = arith.constant 0 : index
    %0 = vector.load %arg1[%c0, %c0_0, %c0_1] : memref<1x8x32xf32, #tpu.memory_space<vmem>>, vector<1x8x32xf32>
    %1 = vector.shape_cast %0 : vector<1x8x32xf32> to vector<8x32xf32>
    %c0_2 = arith.constant 0 : index
    %c0_3 = arith.constant 0 : index
    %2 = vector.load %arg3[%c0_2, %c0_3] : memref<1x32xf32, #tpu.memory_space<vmem>>, vector<1x32xf32>
    %c0_4 = arith.constant 0 : index
    %c0_5 = arith.constant 0 : index
    %3 = vector.load %arg4[%c0_4, %c0_5] : memref<1x32xf32, #tpu.memory_space<vmem>>, vector<1x32xf32>
    %cst = arith.constant dense<0.000000e+00> : vector<8xf32>
    %4 = vector.multi_reduction <add>, %1, %cst [1] : vector<8x32xf32> to vector<8xf32>
    %5 = vector.shape_cast %4 : vector<8xf32> to vector<8x1xf32>
    %cst_6 = arith.constant 3.200000e+01 : f32
    %6 = vector.broadcast %cst_6 : f32 to vector<8x1xf32>
    %7 = arith.divf %5, %6 : vector<8x1xf32>
    %8 = vector.broadcast %7 : vector<8x1xf32> to vector<8x32xf32>
    %9 = arith.subf %1, %8 : vector<8x32xf32>
    %10 = arith.mulf %9, %9 : vector<8x32xf32>
    %cst_7 = arith.constant dense<0.000000e+00> : vector<8xf32>
    %11 = vector.multi_reduction <add>, %10, %cst_7 [1] : vector<8x32xf32> to vector<8xf32>
    %12 = vector.shape_cast %11 : vector<8xf32> to vector<8x1xf32>
    %cst_8 = arith.constant 0.0322580636 : f32
    %13 = vector.broadcast %cst_8 : f32 to vector<8x1xf32>
    %14 = arith.mulf %12, %13 : vector<8x1xf32>
    %15 = math.sqrt %14 : vector<8x1xf32>
    %cst_9 = arith.constant 9.99999997E-7 : f32
    %16 = vector.broadcast %cst_9 : f32 to vector<8x1xf32>
    %17 = arith.addf %15, %16 : vector<8x1xf32>
    %18 = tpu.reciprocal %17 : vector<8x1xf32> -> vector<8x1xf32>
    %19 = vector.broadcast %18 : vector<8x1xf32> to vector<8x32xf32>
    %20 = arith.mulf %9, %19 : vector<8x32xf32>
    %21 = vector.broadcast %2 : vector<1x32xf32> to vector<8x32xf32>
    %22 = arith.mulf %21, %20 : vector<8x32xf32>
    %23 = vector.broadcast %3 : vector<1x32xf32> to vector<8x32xf32>
    %24 = arith.addf %22, %23 : vector<8x32xf32>
    %25 = arith.truncf %24 : vector<8x32xf32> to vector<8x32xbf16>
    %c0_10 = arith.constant 0 : index
    %c0_11 = arith.constant 0 : index
    %26 = vector.load %arg5[%c0_10, %c0_11] : memref<32x32xbf16, #tpu.memory_space<vmem>>, vector<32x32xbf16>
    %cst_12 = arith.constant dense<0.000000e+00> : vector<8x32xf32>
    %27 = tpu.matmul %25, %26, %cst_12 {dimension_numbers = #tpu.dot_dimension_numbers<[1], [0], [0], [1], [0, 0, 1, 1], [], []>} : vector<8x32xbf16>, vector<32x32xbf16>, vector<8x32xf32> -> vector<8x32xf32>
    %c0_13 = arith.constant 0 : index
    %c0_14 = arith.constant 0 : index
    %28 = vector.load %arg6[%c0_13, %c0_14] : memref<1x32xf32, #tpu.memory_space<vmem>>, vector<1x32xf32>
    %29 = vector.broadcast %28 : vector<1x32xf32> to vector<8x32xf32>
    %30 = arith.addf %27, %29 : vector<8x32xf32>
    %c0_15 = arith.constant 0 : index
    %c0_16 = arith.constant 0 : index
    %31 = vector.load %arg7[%c0_15, %c0_16] : memref<32x32xbf16, #tpu.memory_space<vmem>>, vector<32x32xbf16>
    %cst_17 = arith.constant dense<0.000000e+00> : vector<8x32xf32>
    %32 = tpu.matmul %25, %31, %cst_17 {dimension_numbers = #tpu.dot_dimension_numbers<[1], [0], [0], [1], [0, 0, 1, 1], [], []>} : vector<8x32xbf16>, vector<32x32xbf16>, vector<8x32xf32> -> vector<8x32xf32>
    %c0_18 = arith.constant 0 : index
    %c0_19 = arith.constant 0 : index
    %33 = vector.load %arg8[%c0_18, %c0_19] : memref<1x32xf32, #tpu.memory_space<vmem>>, vector<1x32xf32>
    %34 = vector.broadcast %33 : vector<1x32xf32> to vector<8x32xf32>
    %35 = arith.addf %32, %34 : vector<8x32xf32>
    %c0_20 = arith.constant 0 : index
    %c0_21 = arith.constant 0 : index
    %36 = vector.load %arg9[%c0_20, %c0_21] : memref<32x32xbf16, #tpu.memory_space<vmem>>, vector<32x32xbf16>
    %cst_22 = arith.constant dense<0.000000e+00> : vector<8x32xf32>
    %37 = tpu.matmul %25, %36, %cst_22 {dimension_numbers = #tpu.dot_dimension_numbers<[1], [0], [0], [1], [0, 0, 1, 1], [], []>} : vector<8x32xbf16>, vector<32x32xbf16>, vector<8x32xf32> -> vector<8x32xf32>
    %c0_23 = arith.constant 0 : index
    %c0_24 = arith.constant 0 : index
    %38 = vector.load %arg10[%c0_23, %c0_24] : memref<1x32xf32, #tpu.memory_space<vmem>>, vector<1x32xf32>
    %39 = vector.broadcast %38 : vector<1x32xf32> to vector<8x32xf32>
    %40 = arith.addf %37, %39 : vector<8x32xf32>
    %41 = vector.shape_cast %30 : vector<8x32xf32> to vector<1x8x4x8xf32>
    %42 = tpu.transpose %41, [0, 2, 1, 3] : vector<1x8x4x8xf32> -> vector<1x4x8x8xf32>
    %43 = vector.shape_cast %42 : vector<1x4x8x8xf32> to vector<4x8x8xf32>
    %44 = arith.truncf %43 : vector<4x8x8xf32> to vector<4x8x8xbf16>
    %45 = vector.shape_cast %35 : vector<8x32xf32> to vector<1x8x4x8xf32>
    %46 = tpu.transpose %45, [0, 2, 1, 3] : vector<1x8x4x8xf32> -> vector<1x4x8x8xf32>
    %47 = vector.shape_cast %46 : vector<1x4x8x8xf32> to vector<4x8x8xf32>
    %48 = arith.truncf %47 : vector<4x8x8xf32> to vector<4x8x8xbf16>
    %49 = vector.shape_cast %40 : vector<8x32xf32> to vector<1x8x4x8xf32>
    %50 = tpu.transpose %49, [0, 2, 1, 3] : vector<1x8x4x8xf32> -> vector<1x4x8x8xf32>
    %51 = vector.shape_cast %50 : vector<1x4x8x8xf32> to vector<4x8x8xf32>
    %52 = arith.truncf %51 : vector<4x8x8xf32> to vector<4x8x8xbf16>
    "tpu.trace_start"() <{level = 10 : i32, message = "gqd,gkd->gqk"}> : () -> ()
    %cst_25 = arith.constant dense<0.000000e+00> : vector<4x8x8xf32>
    %53 = tpu.matmul %44, %48, %cst_25 {dimension_numbers = #tpu.dot_dimension_numbers<[2], [2], [1], [1], [0, 0, 0, 1, 1, 1], [0], [0]>} : vector<4x8x8xbf16>, vector<4x8x8xbf16>, vector<4x8x8xf32> -> vector<4x8x8xf32>
    "tpu.trace_stop"() : () -> ()
    %54 = vector.shape_cast %53 : vector<4x8x8xf32> to vector<1x4x8x8xf32>
    %c0_26 = arith.constant 0 : index
    %c0_27 = arith.constant 0 : index
    %c0_28 = arith.constant 0 : index
    %55 = vector.load %arg2[%c0_26, %c0_27, %c0_28] : memref<1x8x8xi8, #tpu.memory_space<vmem>>, vector<1x8x8xi8>
    %56 = arith.sitofp %55 : vector<1x8x8xi8> to vector<1x8x8xf32>
    %cst_29 = arith.constant 0.000000e+00 : f32
    %57 = vector.broadcast %cst_29 : f32 to vector<1x8x8xf32>
    %58 = arith.cmpf one, %56, %57 : vector<1x8x8xf32>
    %59 = vector.shape_cast %58 : vector<1x8x8xi1> to vector<1x1x8x8xi1>
    %cst_30 = arith.constant -1.000000e+09 : f32
    %60 = vector.shape_cast %59 : vector<1x1x8x8xi1> to vector<1x1x8x8xi1>
    %61 = vector.broadcast %60 : vector<1x1x8x8xi1> to vector<1x4x8x8xi1>
    %62 = vector.broadcast %cst_30 : f32 to vector<1x4x8x8xf32>
    %63 = arith.select %61, %54, %62 : vector<1x4x8x8xi1>, vector<1x4x8x8xf32>
    %cst_31 = arith.constant dense<0xFF800000> : vector<1x4x8xf32>
    %64 = vector.multi_reduction <maximumf>, %63, %cst_31 [3] : vector<1x4x8x8xf32> to vector<1x4x8xf32>
    %65 = vector.shape_cast %64 : vector<1x4x8xf32> to vector<1x4x8x1xf32>
    %66 = vector.broadcast %65 : vector<1x4x8x1xf32> to vector<1x4x8x8xf32>
    %67 = arith.subf %63, %66 : vector<1x4x8x8xf32>
    %68 = math.exp %67 : vector<1x4x8x8xf32>
    %cst_32 = arith.constant dense<0.000000e+00> : vector<1x4x8xf32>
    %69 = vector.multi_reduction <add>, %68, %cst_32 [3] : vector<1x4x8x8xf32> to vector<1x4x8xf32>
    %70 = vector.shape_cast %69 : vector<1x4x8xf32> to vector<1x4x8x1xf32>
    %71 = tpu.reciprocal %70 {approx = true} : vector<1x4x8x1xf32> -> vector<1x4x8x1xf32>
    %72 = vector.broadcast %71 : vector<1x4x8x1xf32> to vector<1x4x8x8xf32>
    %73 = arith.mulf %68, %72 : vector<1x4x8x8xf32>
    %74 = arith.truncf %73 : vector<1x4x8x8xf32> to vector<1x4x8x8xbf16>
    %75 = vector.shape_cast %74 : vector<1x4x8x8xbf16> to vector<4x8x8xbf16>
    "tpu.trace_start"() <{level = 10 : i32, message = "gqk,gkd->gqd"}> : () -> ()
    %cst_33 = arith.constant dense<0.000000e+00> : vector<4x8x8xf32>
    %76 = tpu.matmul %75, %52, %cst_33 {dimension_numbers = #tpu.dot_dimension_numbers<[2], [1], [1], [2], [0, 0, 0, 1, 1, 2], [0], [0]>} : vector<4x8x8xbf16>, vector<4x8x8xbf16>, vector<4x8x8xf32> -> vector<4x8x8xf32>
    "tpu.trace_stop"() : () -> ()
    %77 = vector.shape_cast %76 : vector<4x8x8xf32> to vector<1x4x8x8xf32>
    %78 = tpu.transpose %77, [0, 2, 1, 3] : vector<1x4x8x8xf32> -> vector<1x8x4x8xf32>
    %79 = vector.shape_cast %78 : vector<1x8x4x8xf32> to vector<8x32xf32>
    %80 = arith.truncf %79 : vector<8x32xf32> to vector<8x32xbf16>
    %c0_34 = arith.constant 0 : index
    %c0_35 = arith.constant 0 : index
    %81 = vector.load %arg11[%c0_34, %c0_35] : memref<32x32xbf16, #tpu.memory_space<vmem>>, vector<32x32xbf16>
    %cst_36 = arith.constant dense<0.000000e+00> : vector<8x32xf32>
    %82 = tpu.matmul %80, %81, %cst_36 {dimension_numbers = #tpu.dot_dimension_numbers<[1], [0], [0], [1], [0, 0, 1, 1], [], []>} : vector<8x32xbf16>, vector<32x32xbf16>, vector<8x32xf32> -> vector<8x32xf32>
    %c0_37 = arith.constant 0 : index
    %c0_38 = arith.constant 0 : index
    %83 = vector.load %arg12[%c0_37, %c0_38] : memref<1x32xf32, #tpu.memory_space<vmem>>, vector<1x32xf32>
    %84 = vector.broadcast %83 : vector<1x32xf32> to vector<8x32xf32>
    %85 = arith.addf %82, %84 : vector<8x32xf32>
    %86 = arith.addf %1, %85 : vector<8x32xf32>
    %c0_39 = arith.constant 0 : index
    %c0_40 = arith.constant 0 : index
    %87 = vector.load %arg13[%c0_39, %c0_40] : memref<1x32xf32, #tpu.memory_space<vmem>>, vector<1x32xf32>
    %c0_41 = arith.constant 0 : index
    %c0_42 = arith.constant 0 : index
    %88 = vector.load %arg14[%c0_41, %c0_42] : memref<1x32xf32, #tpu.memory_space<vmem>>, vector<1x32xf32>
    %cst_43 = arith.constant dense<0.000000e+00> : vector<8xf32>
    %89 = vector.multi_reduction <add>, %86, %cst_43 [1] : vector<8x32xf32> to vector<8xf32>
    %90 = vector.shape_cast %89 : vector<8xf32> to vector<8x1xf32>
    %cst_44 = arith.constant 3.200000e+01 : f32
    %91 = vector.broadcast %cst_44 : f32 to vector<8x1xf32>
    %92 = arith.divf %90, %91 : vector<8x1xf32>
    %93 = vector.broadcast %92 : vector<8x1xf32> to vector<8x32xf32>
    %94 = arith.subf %86, %93 : vector<8x32xf32>
    %95 = arith.mulf %94, %94 : vector<8x32xf32>
    %cst_45 = arith.constant dense<0.000000e+00> : vector<8xf32>
    %96 = vector.multi_reduction <add>, %95, %cst_45 [1] : vector<8x32xf32> to vector<8xf32>
    %97 = vector.shape_cast %96 : vector<8xf32> to vector<8x1xf32>
    %cst_46 = arith.constant 0.0322580636 : f32
    %98 = vector.broadcast %cst_46 : f32 to vector<8x1xf32>
    %99 = arith.mulf %97, %98 : vector<8x1xf32>
    %100 = math.sqrt %99 : vector<8x1xf32>
    %cst_47 = arith.constant 9.99999997E-7 : f32
    %101 = vector.broadcast %cst_47 : f32 to vector<8x1xf32>
    %102 = arith.addf %100, %101 : vector<8x1xf32>
    %103 = tpu.reciprocal %102 : vector<8x1xf32> -> vector<8x1xf32>
    %104 = vector.broadcast %103 : vector<8x1xf32> to vector<8x32xf32>
    %105 = arith.mulf %94, %104 : vector<8x32xf32>
    %106 = vector.broadcast %87 : vector<1x32xf32> to vector<8x32xf32>
    %107 = arith.mulf %106, %105 : vector<8x32xf32>
    %108 = vector.broadcast %88 : vector<1x32xf32> to vector<8x32xf32>
    %109 = arith.addf %107, %108 : vector<8x32xf32>
    %110 = arith.truncf %109 : vector<8x32xf32> to vector<8x32xbf16>
    %c0_48 = arith.constant 0 : index
    %c0_49 = arith.constant 0 : index
    %111 = vector.load %arg15[%c0_48, %c0_49] : memref<32x64xbf16, #tpu.memory_space<vmem>>, vector<32x64xbf16>
    %cst_50 = arith.constant dense<0.000000e+00> : vector<8x64xf32>
    %112 = tpu.matmul %110, %111, %cst_50 {dimension_numbers = #tpu.dot_dimension_numbers<[1], [0], [0], [1], [0, 0, 1, 1], [], []>} : vector<8x32xbf16>, vector<32x64xbf16>, vector<8x64xf32> -> vector<8x64xf32>
    %c0_51 = arith.constant 0 : index
    %c0_52 = arith.constant 0 : index
    %113 = vector.load %arg16[%c0_51, %c0_52] : memref<1x64xf32, #tpu.memory_space<vmem>>, vector<1x64xf32>
    %114 = vector.broadcast %113 : vector<1x64xf32> to vector<8x64xf32>
    %115 = arith.addf %112, %114 : vector<8x64xf32>
    %cst_53 = arith.constant 0.000000e+00 : f32
    %116 = vector.broadcast %cst_53 : f32 to vector<8x64xf32>
    %117 = arith.maximumf %115, %116 : vector<8x64xf32>
    %118 = arith.truncf %117 : vector<8x64xf32> to vector<8x64xbf16>
    %c0_54 = arith.constant 0 : index
    %c0_55 = arith.constant 0 : index
    %119 = vector.load %arg17[%c0_54, %c0_55] : memref<64x32xbf16, #tpu.memory_space<vmem>>, vector<64x32xbf16>
    %cst_56 = arith.constant dense<0.000000e+00> : vector<8x32xf32>
    %120 = tpu.matmul %118, %119, %cst_56 {dimension_numbers = #tpu.dot_dimension_numbers<[1], [0], [0], [1], [0, 0, 1, 1], [], []>} : vector<8x64xbf16>, vector<64x32xbf16>, vector<8x32xf32> -> vector<8x32xf32>
    %c0_57 = arith.constant 0 : index
    %c0_58 = arith.constant 0 : index
    %121 = vector.load %arg18[%c0_57, %c0_58] : memref<1x32xf32, #tpu.memory_space<vmem>>, vector<1x32xf32>
    %122 = vector.broadcast %121 : vector<1x32xf32> to vector<8x32xf32>
    %123 = arith.addf %120, %122 : vector<8x32xf32>
    %124 = arith.addf %86, %123 : vector<8x32xf32>
    %125 = vector.shape_cast %124 : vector<8x32xf32> to vector<1x8x32xf32>
    %c0_59 = arith.constant 0 : index
    %c0_60 = arith.constant 0 : index
    %c0_61 = arith.constant 0 : index
    %126 = vector.load %arg19[%c0_59, %c0_60, %c0_61] : memref<1x8x32xf32, #tpu.memory_space<vmem>>, vector<1x8x32xf32>
    tpu.vector_store %arg19[%c0_59, %c0_60, %c0_61], %125 {strides = array<i32>} : memref<1x8x32xf32, #tpu.memory_space<vmem>>, vector<1x8x32xf32>,
    return
  }
  func.func @transform_0(%arg0: i32) -> (i32, i32, i32) {
    %c0_i32 = arith.constant 0 : i32
    %c0_i32_0 = arith.constant 0 : i32
    %c0_i32_1 = arith.constant 0 : i32
    return %arg0, %c0_i32, %c0_i32_0 : i32, i32, i32
  }
  func.func @transform_1(%arg0: i32) -> (i32, i32, i32) {
    %c0_i32 = arith.constant 0 : i32
    %c0_i32_0 = arith.constant 0 : i32
    %c0_i32_1 = arith.constant 0 : i32
    return %arg0, %c0_i32, %c0_i32_0 : i32, i32, i32
  }
  func.func @transform_2(%arg0: i32) -> (i32, i32) {
    %c0_i32 = arith.constant 0 : i32
    %c0_i32_0 = arith.constant 0 : i32
    %c0_i32_1 = arith.constant 0 : i32
    return %c0_i32, %c0_i32_0 : i32, i32
  }
  func.func @transform_3(%arg0: i32) -> (i32, i32) {
    %c0_i32 = arith.constant 0 : i32
    %c0_i32_0 = arith.constant 0 : i32
    %c0_i32_1 = arith.constant 0 : i32
    return %c0_i32, %c0_i32_0 : i32, i32
  }
  func.func @transform_4(%arg0: i32) -> (i32, i32) {
    %c0_i32 = arith.constant 0 : i32
    %c0_i32_0 = arith.constant 0 : i32
    %c0_i32_1 = arith.constant 0 : i32
    return %c0_i32, %c0_i32_0 : i32, i32
  }
  func.func @transform_5(%arg0: i32) -> (i32, i32) {
    %c0_i32 = arith.constant 0 : i32
    %c0_i32_0 = arith.constant 0 : i32
    %c0_i32_1 = arith.constant 0 : i32
    return %c0_i32, %c0_i32_0 : i32, i32
  }
  func.func @transform_6(%arg0: i32) -> (i32, i32) {
    %c0_i32 = arith.constant 0 : i32
    %c0_i32_0 = arith.constant 0 : i32
    %c0_i32_1 = arith.constant 0 : i32
    return %c0_i32, %c0_i32_0 : i32, i32
  }
  func.func @transform_7(%arg0: i32) -> (i32, i32) {
    %c0_i32 = arith.constant 0 : i32
    %c0_i32_0 = arith.constant 0 : i32
    %c0_i32_1 = arith.constant 0 : i32
    return %c0_i32, %c0_i32_0 : i32, i32
  }
  func.func @transform_8(%arg0: i32) -> (i32, i32) {
    %c0_i32 = arith.constant 0 : i32
    %c0_i32_0 = arith.constant 0 : i32
    %c0_i32_1 = arith.constant 0 : i32
    return %c0_i32, %c0_i32_0 : i32, i32
  }
  func.func @transform_9(%arg0: i32) -> (i32, i32) {
    %c0_i32 = arith.constant 0 : i32
    %c0_i32_0 = arith.constant 0 : i32
    %c0_i32_1 = arith.constant 0 : i32
    return %c0_i32, %c0_i32_0 : i32, i32
  }
  func.func @transform_10(%arg0: i32) -> (i32, i32) {
    %c0_i32 = arith.constant 0 : i32
    %c0_i32_0 = arith.constant 0 : i32
    %c0_i32_1 = arith.constant 0 : i32
    return %c0_i32, %c0_i32_0 : i32, i32
  }
  func.func @transform_11(%arg0: i32) -> (i32, i32) {
    %c0_i32 = arith.constant 0 : i32
    %c0_i32_0 = arith.constant 0 : i32
    %c0_i32_1 = arith.constant 0 : i32
    return %c0_i32, %c0_i32_0 : i32, i32
  }
  func.func @transform_12(%arg0: i32) -> (i32, i32) {
    %c0_i32 = arith.constant 0 : i32
    %c0_i32_0 = arith.constant 0 : i32
    %c0_i32_1 = arith.constant 0 : i32
    return %c0_i32, %c0_i32_0 : i32, i32
  }
  func.func @transform_13(%arg0: i32) -> (i32, i32) {
    %c0_i32 = arith.constant 0 : i32
    %c0_i32_0 = arith.constant 0 : i32
    %c0_i32_1 = arith.constant 0 : i32
    return %c0_i32, %c0_i32_0 : i32, i32
  }
  func.func @transform_14(%arg0: i32) -> (i32, i32) {
    %c0_i32 = arith.constant 0 : i32
    %c0_i32_0 = arith.constant 0 : i32
    %c0_i32_1 = arith.constant 0 : i32
    return %c0_i32, %c0_i32_0 : i32, i32
  }
  func.func @transform_15(%arg0: i32) -> (i32, i32) {
    %c0_i32 = arith.constant 0 : i32
    %c0_i32_0 = arith.constant 0 : i32
    %c0_i32_1 = arith.constant 0 : i32
    return %c0_i32, %c0_i32_0 : i32, i32
  }
  func.func @transform_16(%arg0: i32) -> (i32, i32) {
    %c0_i32 = arith.constant 0 : i32
    %c0_i32_0 = arith.constant 0 : i32
    %c0_i32_1 = arith.constant 0 : i32
    return %c0_i32, %c0_i32_0 : i32, i32
  }
  func.func @transform_17(%arg0: i32) -> (i32, i32) {
    %c0_i32 = arith.constant 0 : i32
    %c0_i32_0 = arith.constant 0 : i32
    %c0_i32_1 = arith.constant 0 : i32
    return %c0_i32, %c0_i32_0 : i32, i32
  }
  func.func @transform_18(%arg0: i32) -> (i32, i32, i32) {
    %c0_i32 = arith.constant 0 : i32
    %c0_i32_0 = arith.constant 0 : i32
    %c0_i32_1 = arith.constant 0 : i32
    return %arg0, %c0_i32, %c0_i32_0 : i32, i32, i32
  }
}

</mosaic_0001>

<bundles_post_ra>
// kernel: tpu_custom_call.1
= control target key start
LH: loop header
LB: loop body
LE: loop exit
PB: predicated region body
PF: predicated region fallthrough
CT: control target
= control target key end

     0   :  { %s3870_s0 = inlined_call_operand.vmem [shape: f32[2,8,32], index: 0, kind: input, shape index: {}]   ;;  %s3871_s1 = inlined_call_operand.hbm [shape: s8[2,8,8], index: 1, kind: input, shape index: {}]   ;;  %s3872_s2 = inlined_call_operand.vmem [shape: f32[1,32], index: 2, kind: input, shape index: {}]   ;;  %s3873_s3 = inlined_call_operand.hbm [shape: f32[1,32], index: 3, kind: input, shape index: {}]   ;;  %s3874_s4 = inlined_call_operand.vmem [shape: bf16[32,32], index: 4, kind: input, shape index: {}]   ;;  %s3875_s5 = inlined_call_operand.hbm [shape: f32[1,32], index: 5, kind: input, shape index: {}]   ;;  %s3876_s6 = inlined_call_operand.vmem [shape: bf16[32,32], index: 6, kind: input, shape index: {}]   ;;  %s3877_s7 = inlined_call_operand.hbm [shape: f32[1,32], index: 7, kind: input, shape index: {}]   ;;  %s3878_s8 = inlined_call_operand.hbm [shape: bf16[32,32], index: 8, kind: input, shape index: {}]   ;;  %s3879_s9 = inlined_call_operand.hbm [shape: f32[1,32], index: 9, kind: input, shape index: {}]   ;;  %s3880_s10 = inlined_call_operand.vmem [shape: bf16[32,32], index: 10, kind: input, shape index: {}]   ;;  %s3881_s11 = inlined_call_operand.hbm [shape: f32[1,32], index: 11, kind: input, shape index: {}]   ;;  %s3882_s12 = inlined_call_operand.hbm [shape: f32[1,32], index: 12, kind: input, shape index: {}]   ;;  %s3883_s13 = inlined_call_operand.hbm [shape: f32[1,32], index: 13, kind: input, shape index: {}]   ;;  %s3884_s14 = inlined_call_operand.vmem [shape: bf16[32,64], index: 14, kind: input, shape index: {}]   ;;  %s3885_s15 = inlined_call_operand.vmem [shape: f32[1,64], index: 15, kind: input, shape index: {}]   ;;  %s3886_s16 = inlined_call_operand.vmem [shape: bf16[64,32], index: 16, kind: input, shape index: {}]   ;;  %s3887_s17 = inlined_call_operand.vmem [shape: f32[1,32], index: 17, kind: input, shape index: {}]   ;;  %s3888_s18 = inlined_call_operand.hbm [shape: f32[2,8,32], index: 18, kind: output, shape index: {}]  }
   0x1   :  { %3897 = sst [smem:[#allocation24_spill]] %s3870_s0 }
   0x2   :  { %3898 = sst [smem:[#allocation25_spill]] %s3871_s1 }
   0x3   :  { %3899 = sst [smem:[#allocation26_spill]] %s3872_s2 }
   0x4   :  { %3900 = sst [smem:[#allocation27_spill]] %s3873_s3 }
   0x5   :  { %3901 = sst [smem:[#allocation28_spill]] %s3874_s4 }
   0x6   :  { %3902 = sst [smem:[#allocation29_spill]] %s3875_s5 }
   0x7   :  { %3903 = sst [smem:[#allocation30_spill]] %s3877_s7 }
   0x8   :  { %3904 = sst [smem:[#allocation31_spill]] %s3880_s10 }
   0x9   :  { %3905 = sst [smem:[#allocation32_spill]] %s3884_s14 }
   0xa   :  { %3906 = sst [smem:[#allocation33_spill]] %s3885_s15 }
   0xb   :  { %3907 = sst [smem:[#allocation34_spill]] %s3886_s16 }
   0xc   :  { %3908 = sst [smem:[#allocation35_spill]] %s3887_s17 }
   0xd   :  { %3909 = sst [smem:[#allocation36_spill]] %s3888_s18 }
   0xe   :  { %23 = vsyncpa [#allocation3], 0 }
   0xf   :  { %25 = vsyncpa [#allocation3 + $0x1], 0 }
  0x10   :  { %26 = vsyncpa [#allocation6], 0 }
  0x11   :  { %27 = vsyncpa [#allocation9], 0 }
  0x12   :  { %28 = vsyncpa [#allocation12], 0 }
  0x13   :  { %29 = vsyncpa [#allocation15], 0 }
  0x14   :  { %30 = vsyncpa [#allocation4], 0 }
  0x15   :  { %32 = vsyncpa [#allocation4 + $0x1], 0  ;;  %s3247_s27 = smov 0   ;;  %s3249_s28 = smov 0  }
  0x16   :  { %s3251_s29 = smov 0   ;;  %s3253_s30 = smov 0  }
  0x17 LB: > { %s3130_s0 = smov [#allocation5]   ;;  %s3268_s1 = sadd.s32 4294967295, %s3128_s30   ;;  %s3128_s30 = sphi %s3253_s30, %s3947_s30   ;;  %s3124_s29 = sphi %s3251_s29, %s3946_s29   ;;  %s3120_s28 = sphi %s3249_s28, %s3945_s28   ;;  %s3116_s27 = sphi %s3247_s27, %s3944_s27  }
  0x18   : > { %s473_s19 = sshll.u32 %s3130_s0, 4  ;;  %p2405_p0 = scmp.ge.s32.totalorder %s3128_s30, 1  ;;  %s3273_s19 = int_to_ptr.vmem [resolvable:$true] %s473_s19 }
  0x19   : > { %p3894_p1 = scmp.eq.s32.totalorder %s3268_s1, 0  ;;  %p457_p2 = scmp.lt.s32.totalorder %s3128_s30, 3 }
  0x1a   : > { %s3131_s21 = smov [#allocation8]   ;;  %s3132_s2 = smov [#allocation11]  }
  0x1b   : > { %p3275_p3 = pnand %p2405_p0, %p457_p2  ;;  %s501_s22 = sshll.u32 %s3131_s21, 4  ;;  %s3282_s22 = int_to_ptr.vmem [resolvable:$true] %s501_s22 }
  0x1c   : > { %s525_s23 = sshll.u32 %s3132_s2, 4  ;;  %s3133_s25 = smov [#allocation14]   ;;  %s3290_s23 = int_to_ptr.vmem [resolvable:$true] %s525_s23 }
  0x1d   : > { %s3910_s20 = scalar_select %p3275_p3, 1, 0 }
  0x1e   : > { %p2651_p5 = pneg %p3275_p3  ;;  %s3292_s26 = sshll.u32 %s3133_s25, 4  ;;  %s551_s26 = int_to_ptr.vmem [resolvable:$true] %s3292_s26 }
  0x1f   : > { %s3912_s3 = sld [smem:[#allocation27_spill]] }
  0x20   : > { %p3286_p6 = pnand %p2651_p5, %p3894_p1 }
  0x22   : > { %p3302_p8 = pneg %p3286_p6 }
  0x25   : > { %s2792_s17 = scalar_lea.hbm %s3912_s3, 16 }
  0x26   : > { %p2793_p7 = scmp.ne.s32.totalorder %s3912_s3, %s2792_s17  ;;  %p2799_p11 = scmp.lt.u32.totalorder %s2792_s17, %s3912_s3 }
  0x28   : > { %p2795_p9 = pnand %p3302_p8, %p2793_p7 }
  0x2a   : > { %p2796_p10 = pneg %p2795_p9 }
  0x2c   : > { %p2801_p12 = pnand %p2799_p11, %p2796_p10 }
  0x2e   : > { %2804 = shalt.err (!%p2801_p12)
}
  0x2f   : > { %s2805_s15 = scalar_lea.vmem %s3273_s19, 16  ;;  %s2812_s18 = scalar_lea.vmem %s3273_s19, 32 }
  0x30   : > { %p2806_p13 = scmp.ne.s32.totalorder %s3273_s19, %s2805_s15  ;;  %p2813_p5 = scmp.lt.s32.totalorder %s3273_s19, %s3273_s19 }
  0x31   : > { %p2814_p7 = scmp.lt.s32.totalorder %s2812_s18, %s2805_s15 }
  0x32   : > { %p2808_p0 = pnand %p2806_p13, %p3302_p8 }
  0x33   : > { %p2815_p9 = por %p2814_p7, %p2813_p5 }
  0x34   : > { %p2809_p2 = pneg %p2808_p0 }
  0x36   : > { %p2816_p4 = pnand %p2815_p9, %p2809_p2 }
  0x38   : > { %2819 = shalt.err (!%p2816_p4)
}
  0x39   : > { %2654 = dma.hbm_to_vmem [thread:$0]  (!%p3286_p6), %s3912_s3, 16, %s3273_s19, [#allocation6]  }
  0x3a   : > { %s3914_s7 = sld [smem:[#allocation30_spill]] }
  0x40   : > { %s2820_s25 = scalar_lea.hbm %s3914_s7, 16 }
  0x41   : > { %p2821_p10 = scmp.ne.s32.totalorder %s3914_s7, %s2820_s25  ;;  %p2827_p4 = scmp.lt.u32.totalorder %s2820_s25, %s3914_s7 }
  0x43   : > { %p2823_p11 = pnand %p2821_p10, %p3302_p8 }
  0x45   : > { %p2824_p12 = pneg %p2823_p11 }
  0x47   : > { %p2829_p13 = pnand %p2827_p4, %p2824_p12 }
  0x49   : > { %2832 = shalt.err (!%p2829_p13)
}
  0x4a   : > { %s2833_s19 = scalar_lea.vmem %s3282_s22, 16  ;;  %s2840_s10 = scalar_lea.vmem %s3282_s22, 32 }
  0x4b   : > { %p2834_p0 = scmp.ne.s32.totalorder %s3282_s22, %s2833_s19  ;;  %p2841_p7 = scmp.lt.s32.totalorder %s3282_s22, %s3282_s22 }
  0x4c   : > { %p2842_p9 = scmp.lt.s32.totalorder %s2840_s10, %s2833_s19 }
  0x4d   : > { %p2836_p2 = pnand %p2834_p0, %p3302_p8 }
  0x4e   : > { %p2843_p10 = por %p2842_p9, %p2841_p7 }
  0x4f   : > { %p2837_p5 = pneg %p2836_p2 }
  0x51   : > { %p2844_p11 = pnand %p2843_p10, %p2837_p5 }
  0x53   : > { %2847 = shalt.err (!%p2844_p11)
}
  0x54   : > { %2660 = dma.hbm_to_vmem [thread:$0]  (!%p3286_p6), %s3914_s7, 16, %s3282_s22, [#allocation9]  }
  0x55   : > { %s2848_s21 = scalar_lea.hbm %s3879_s9, 16 }
  0x56   : > { %p2849_p12 = scmp.ne.s32.totalorder %s3879_s9, %s2848_s21  ;;  %p2855_p0 = scmp.lt.u32.totalorder %s2848_s21, %s3879_s9 }
  0x58   : > { %p2851_p4 = pnand %p2849_p12, %p3302_p8 }
  0x5a   : > { %p2852_p13 = pneg %p2851_p4 }
  0x5c   : > { %p2857_p2 = pnand %p2855_p0, %p2852_p13 }
  0x5e   : > { %2860 = shalt.err (!%p2857_p2)
}
  0x5f   : > { %s2861_s22 = scalar_lea.vmem %s3290_s23, 16  ;;  %s2868_s10 = scalar_lea.vmem %s3290_s23, 32 }
  0x60   : > { %p2862_p5 = scmp.ne.s32.totalorder %s3290_s23, %s2861_s22  ;;  %p2869_p10 = scmp.lt.s32.totalorder %s3290_s23, %s3290_s23 }
  0x61   : > { %p2870_p11 = scmp.lt.s32.totalorder %s2868_s10, %s2861_s22 }
  0x62   : > { %p2864_p7 = pnand %p2862_p5, %p3302_p8 }
  0x63   : > { %p2871_p12 = por %p2870_p11, %p2869_p10 }
  0x64   : > { %p2865_p9 = pneg %p2864_p7 }
  0x66   : > { %p2872_p4 = pnand %p2871_p12, %p2865_p9 }
  0x68   : > { %2875 = shalt.err (!%p2872_p4)
}
  0x69   : > { %2666 = dma.hbm_to_vmem [thread:$0]  (!%p3286_p6), %s3879_s9, 16, %s3290_s23, [#allocation12]  }
  0x6a   : > { %s3134_s17 = smov [#allocation7]   ;;  %s2876_s15 = scalar_lea.hbm %s3882_s12, 16 }
  0x6b   : > { %s487_s0 = sshll.u32 %s3134_s17, 4  ;;  %p2877_p13 = scmp.ne.s32.totalorder %s3882_s12, %s2876_s15  ;;  %s488_s0 = int_to_ptr.vmem [resolvable:$true] %s487_s0 }
  0x6c   : > { %p2883_p5 = scmp.lt.u32.totalorder %s2876_s15, %s3882_s12 }
  0x6d   : > { %p2879_p0 = pnand %p2877_p13, %p3302_p8 }
  0x6f   : > { %p2880_p2 = pneg %p2879_p0 }
  0x71   : > { %p2885_p7 = pnand %p2883_p5, %p2880_p2 }
  0x73   : > { %2888 = shalt.err (!%p2885_p7)
}
  0x74   : > { %s2889_s23 = scalar_lea.vmem %s551_s26, 16  ;;  %s2896_s14 = scalar_lea.vmem %s551_s26, 32 }
  0x75   : > { %p2890_p9 = scmp.ne.s32.totalorder %s551_s26, %s2889_s23  ;;  %p2897_p12 = scmp.lt.s32.totalorder %s551_s26, %s551_s26 }
  0x76   : > { %p2898_p4 = scmp.lt.s32.totalorder %s2896_s14, %s2889_s23 }
  0x77   : > { %p2892_p10 = pnand %p2890_p9, %p3302_p8 }
  0x78   : > { %p2899_p1 = por %p2898_p4, %p2897_p12 }
  0x79   : > { %p2893_p11 = pneg %p2892_p10 }
  0x7b   : > { %p2900_p3 = pnand %p2899_p1, %p2893_p11 }
  0x7d   : > { %2903 = shalt.err (!%p2900_p3)
}
  0x7e   : > { %2672 = dma.hbm_to_vmem [thread:$0]  (!%p3286_p6), %s3882_s12, 16, %s551_s26, [#allocation15]  }
  0x7f   : > { %s3915_s5 = sld [smem:[#allocation29_spill]] }
  0x85   : > { %s2904_s15 = scalar_lea.hbm %s3915_s5, 16 }
  0x86   : > { %p2905_p13 = scmp.ne.s32.totalorder %s3915_s5, %s2904_s15  ;;  %p2911_p3 = scmp.lt.u32.totalorder %s2904_s15, %s3915_s5 }
  0x88   : > { %p2907_p0 = pnand %p2905_p13, %p3302_p8 }
  0x8a   : > { %p2908_p1 = pneg %p2907_p0 }
  0x8c   : > { %p2913_p2 = pnand %p2911_p3, %p2908_p1 }
  0x8e   : > { %2916 = shalt.err (!%p2913_p2)
}
  0x8f   : > { %s2917_s23 = scalar_lea.vmem %s488_s0, 16  ;;  %s2924_s26 = scalar_lea.vmem %s488_s0, 32 }
  0x90   : > { %p2918_p5 = scmp.ne.s32.totalorder %s488_s0, %s2917_s23  ;;  %p2925_p10 = scmp.lt.s32.totalorder %s488_s0, %s488_s0 }
  0x91   : > { %p2926_p11 = scmp.lt.s32.totalorder %s2924_s26, %s2917_s23 }
  0x92   : > { %p2920_p7 = pnand %p2918_p5, %p3302_p8 }
  0x93   : > { %p2927_p12 = por %p2926_p11, %p2925_p10 }
  0x94   : > { %p2921_p9 = pneg %p2920_p7 }
  0x96   : > { %p2928_p4 = pnand %p2927_p12, %p2921_p9 }
  0x98   : > { %2931 = shalt.err (!%p2928_p4)
}
  0x99   : > { %2657 = dma.hbm_to_vmem [thread:$0]  (!%p3286_p6), %s3915_s5, 16, %s488_s0, [#allocation6]  }
  0x9a   : > { %s3135_s17 = smov [#allocation10]   ;;  %s2932_s18 = scalar_lea.hbm %s3878_s8, 256 }
  0x9b   : > { %s511_s21 = sshll.u32 %s3135_s17, 4  ;;  %p2933_p13 = scmp.ne.s32.totalorder %s3878_s8, %s2932_s18  ;;  %s512_s21 = int_to_ptr.vmem [resolvable:$true] %s511_s21 }
  0x9c   : > { %p2939_p3 = scmp.lt.u32.totalorder %s2932_s18, %s3878_s8 }
  0x9d   : > { %p2935_p0 = pnand %p2933_p13, %p3302_p8 }
  0x9f   : > { %p2936_p1 = pneg %p2935_p0 }
  0xa1   : > { %p2941_p2 = pnand %p2939_p3, %p2936_p1 }
  0xa3   : > { %2944 = shalt.err (!%p2941_p2)
}
  0xa4   : > { %s2945_s0 = scalar_lea.vmem %s512_s21, 256  ;;  %p2953_p10 = scmp.lt.s32.totalorder %s512_s21, %s512_s21 }
  0xa5   : > { %p2946_p5 = scmp.ne.s32.totalorder %s512_s21, %s2945_s0  ;;  %p2954_p11 = scmp.lt.s32.totalorder %s2945_s0, %s2945_s0 }
  0xa7   : > { %p2948_p7 = pnand %p2946_p5, %p3302_p8  ;;  %p2955_p12 = por %p2954_p11, %p2953_p10 }
  0xa9   : > { %p2949_p9 = pneg %p2948_p7 }
  0xab   : > { %p2956_p4 = pnand %p2955_p12, %p2949_p9 }
  0xad   : > { %2959 = shalt.err (!%p2956_p4)
}
  0xae   : > { %s3136_s26 = smov 64   ;;  %s3137_s14 = smov 4  }
  0xaf   : > { %2663 = dma.hbm_to_vmem [thread:$0]  (!%p3286_p6), %s3878_s8, 256, %s512_s21, [#allocation9], %s3136_s26, %s3136_s26, %s3137_s14  }
  0xb0   : > { %s3138_s25 = smov [#allocation13]   ;;  %s3139_s18 = smov [#allocation16]  }
  0xb1   : > { %s539_s15 = sshll.u32 %s3138_s25, 4  ;;  %s561_s19 = sshll.u32 %s3139_s18, 4  ;;  %s540_s15 = int_to_ptr.vmem [resolvable:$true] %s539_s15  ;;  %s3427_s19 = int_to_ptr.vmem [resolvable:$true] %s561_s19 }
  0xb2   : > { %s2960_s23 = scalar_lea.hbm %s3881_s11, 16 }
  0xb3   : > { %p2961_p13 = scmp.ne.s32.totalorder %s3881_s11, %s2960_s23  ;;  %p2967_p3 = scmp.lt.u32.totalorder %s2960_s23, %s3881_s11 }
  0xb5   : > { %p2963_p0 = pnand %p2961_p13, %p3302_p8 }
  0xb7   : > { %p2964_p1 = pneg %p2963_p0 }
  0xb9   : > { %p2969_p2 = pnand %p2967_p3, %p2964_p1 }
  0xbb   : > { %2972 = shalt.err (!%p2969_p2)
}
  0xbc   : > { %s2973_s26 = scalar_lea.vmem %s540_s15, 16  ;;  %s2980_s14 = scalar_lea.vmem %s540_s15, 32 }
  0xbd   : > { %p2974_p5 = scmp.ne.s32.totalorder %s540_s15, %s2973_s26  ;;  %p2981_p10 = scmp.lt.s32.totalorder %s540_s15, %s540_s15 }
  0xbe   : > { %p2982_p11 = scmp.lt.s32.totalorder %s2980_s14, %s2973_s26 }
  0xbf   : > { %p2976_p7 = pnand %p2974_p5, %p3302_p8 }
  0xc0   : > { %p2983_p12 = por %p2982_p11, %p2981_p10 }
  0xc1   : > { %p2977_p9 = pneg %p2976_p7 }
  0xc3   : > { %p2984_p4 = pnand %p2983_p12, %p2977_p9 }
  0xc5   : > { %2987 = shalt.err (!%p2984_p4)
}
  0xc6   : > { %2669 = dma.hbm_to_vmem [thread:$0]  (!%p3286_p6), %s3881_s11, 16, %s540_s15, [#allocation12]  }
  0xc7   : > { %s2988_s22 = scalar_lea.hbm %s3883_s13, 16 }
  0xc8   : > { %p2989_p13 = scmp.ne.s32.totalorder %s3883_s13, %s2988_s22  ;;  %p2995_p3 = scmp.lt.u32.totalorder %s2988_s22, %s3883_s13 }
  0xca   : > { %p2991_p0 = pnand %p2989_p13, %p3302_p8 }
  0xcc   : > { %p2992_p1 = pneg %p2991_p0 }
  0xce   : > { %p2997_p2 = pnand %p2995_p3, %p2992_p1 }
  0xd0   : > { %3000 = shalt.err (!%p2997_p2)
}
  0xd1   : > { %s3001_s15 = scalar_lea.vmem %s3427_s19, 16  ;;  %s3008_s21 = scalar_lea.vmem %s3427_s19, 32 }
  0xd2   : > { %p3002_p5 = scmp.ne.s32.totalorder %s3427_s19, %s3001_s15  ;;  %p3009_p10 = scmp.lt.s32.totalorder %s3427_s19, %s3427_s19 }
  0xd3   : > { %p3010_p11 = scmp.lt.s32.totalorder %s3008_s21, %s3001_s15 }
  0xd4   : > { %p3004_p7 = pnand %p3002_p5, %p3302_p8 }
  0xd5   : > { %p3011_p12 = por %p3010_p11, %p3009_p10 }
  0xd6   : > { %p3005_p9 = pneg %p3004_p7 }
  0xd8   : > { %p3012_p4 = pnand %p3011_p12, %p3005_p9 }
  0xda   : > { %3015 = shalt.err (!%p3012_p4)
}
  0xdb   : > { %2675 = dma.hbm_to_vmem [thread:$0]  (!%p3286_p6), %s3883_s13, 16, %s3427_s19, [#allocation15]  }
  0xdc   : > { %s2404_s24 = sadd.s32 4294967294, %s3128_s30   ;;  %s3473_s2 = sadd.s32 1, %s3128_s30  }
  0xdd   : > { %s68_s3 = ssub.s32 %s3128_s30, %s3473_s2  ;;  %s71_s17 = sadd.s32 1, %s3124_s29 }
  0xde   : > { %p69_p8 = scmp.eq.s32.totalorder %s68_s3, 0  ;;  %p78_p13 = scmp.ne.s32.totalorder %s3124_s29, %s3120_s28 }
  0xdf   : > { %p79_p0 = scmp.eq.s32.totalorder %s3128_s30, 0  ;;  %p84_p1 = scmp.ne.s32.totalorder %s3120_s28, %s3116_s27 }
  0xe0   : > { %s3484_s25 = scalar_select %p69_p8, %s3124_s29, %s71_s17  }
  0xe1   : > { %p3486_p3 = por %p79_p0, %p78_p13  ;;  %p3917_p2 = scmp.eq.s32.totalorder %s3268_s1, 0 }
  0xe2   : > { %p444_p5 = scmp.eq.s32.totalorder %s3268_s1, 1  ;;  %p450_p7 = scmp.eq.s32.totalorder %s2404_s24, 1 }
  0xe3   : > { %p3492_p6 = por %p3917_p2, %p84_p1  ;;  %p2692_p9 = scmp.lt.s32.totalorder %s3128_s30, 2 }
  0xe4   : > { %s591_s22 = sand.u32 1, %s3124_s29   ;;  %p3499_p10 = por %p444_p5, %p78_p13 }
  0xe5   : > { %p3503_p11 = por %p450_p7, %p84_p1  ;;  %s2415_s0 = sshll.u32 %s591_s22, 1 }
  0xe6   : > { %s3919_s10 = scalar_select %p3499_p10, 1, 0 }
  0xe7   : > { %s3920_s23 = scalar_select %p3503_p11, 1, 0 }
  0xe8   : > { %s2416_s16 = sshll.u32 %s3128_s30, 5  ;;  %s3921_s26 = sld [smem:[#allocation25_spill]] }
  0xe9   : > { %s595_s24 = scalar_lea.vmem [#allocation2], %s2415_s0  ;;  %p3517_p12 = pnand %p2692_p9, %p3486_p3 }
  0xea   : > { %s602_s3 = sshll.u32 %s595_s24, 4  ;;  %s592_s5 = scalar_lea.sflag [#allocation3], %s591_s22  ;;  %s3513_s3 = int_to_ptr.vmem [resolvable:$true] %s602_s3 }
  0xeb   : > { %p3018_p8 = pneg %p3517_p12 }
  0xee   : > { %s3511_s14 = scalar_lea.hbm %s3921_s26, %s2416_s16  ;;  %s3021_s15 = scalar_lea.hbm %s3921_s26, 64 }
  0xef   : > { %s3016_s7 = scalar_lea.hbm %s3511_s14, 32  ;;  %p3022_p1 = scmp.lt.u32.totalorder %s3511_s14, %s3921_s26 }
  0xf0   : > { %p3017_p4 = scmp.ne.s32.totalorder %s3511_s14, %s3016_s7  ;;  %p3023_p3 = scmp.lt.u32.totalorder %s3021_s15, %s3016_s7 }
  0xf1   : > { %p3025_p5 = scmp.lt.u32.totalorder %s3016_s7, %s3511_s14 }
  0xf2   : > { %p3019_p13 = pnand %p3018_p8, %p3017_p4  ;;  %p3024_p2 = por %p3023_p3, %p3022_p1 }
  0xf4   : > { %p3020_p0 = pneg %p3019_p13  ;;  %p3026_p7 = por %p3025_p5, %p3024_p2 }
  0xf6   : > { %p3027_p9 = pnand %p3026_p7, %p3020_p0 }
  0xf8   : > { %3030 = shalt.err (!%p3027_p9)
}
  0xf9   : > { %s3031_s22 = scalar_lea.vmem %s3513_s3, 32  ;;  %s3140_s24 = smov [#allocation2]  }
  0xfa   : > { %p3032_p4 = scmp.ne.s32.totalorder %s3513_s3, %s3031_s22  ;;  %s3036_s0 = sshll.u32 %s3140_s24, 4  ;;  %s3037_s0 = int_to_ptr.vmem [resolvable:$false] %s3036_s0 }
  0xfb   : > { %s3038_s16 = scalar_lea.vmem %s3037_s0, 64  ;;  %p3039_p10 = scmp.lt.s32.totalorder %s3513_s3, %s3037_s0 }
  0xfc   : > { %p3034_p13 = pnand %p3032_p4, %p3018_p8  ;;  %p3040_p1 = scmp.lt.s32.totalorder %s3038_s16, %s3031_s22 }
  0xfe   : > { %p3035_p11 = pneg %p3034_p13  ;;  %p3041_p3 = por %p3040_p1, %p3039_p10 }
 0x100   : > { %p3042_p2 = pnand %p3041_p3, %p3035_p11 }
 0x102   : > { %3045 = shalt.err (!%p3042_p2)
}
 0x103   : > { %2679 = dma.hbm_to_vmem [thread:$0]  (!%p3517_p12), %s3511_s14, 32, %s3513_s3, %s592_s5  }
 0x104   : > { %p3923_p0 = scmp.ne.s32.totalorder %s3910_s20, 0 }
 0x105   : > { %s3549_s7 = sand.u32 (!%p3923_p0), 1, %s3120_s28  }
 0x106   : > { %611 = sbr.rel (%p3923_p0) target bundleno = 2915 (0xb63), region = 92  ;;  %s2418_s15 = sshll.u32 (!%p3923_p0), %s3549_s7, 1 }
 0x107   : > { %s614_s18 = scalar_lea.sflag (!%p3923_p0), [#allocation3], %s3549_s7  ;;  %s3553_s21 = scalar_lea.vmem (!%p3923_p0), [#allocation2], %s2418_s15 }
 0x10d   : > { %3091 = dma.done.wait (%p3492_p6), %s614_s18, 32  }
 0x10e   : > { %3093 = vsyncadd (%p3492_p6), %s614_s18, 4294967264  ;;  %p3924_p10 = scmp.eq.s32.totalorder %s3268_s1, 0 }
 0x110   : > { %3095 = dma.done.wait (%p3924_p10), [#allocation6], 32   ;;  %p3925_p11 = pmov %p3924_p10 }
 0x111   : > { %p3926_p12 = pmov %p3924_p10 }
 0x112   : > { %3097 = vsyncadd (%p3925_p11), [#allocation6], 4294967264 }
 0x113   : > { %3099 = dma.done.wait (%p3926_p12), [#allocation9], 272   ;;  %p3927_p8 = pmov %p3924_p10 }
 0x115   : > { %3101 = vsyncadd (%p3927_p8), [#allocation9], 4294967024  ;;  %p3928_p5 = pmov %p3927_p8 }
 0x117   : > { %3103 = dma.done.wait (%p3928_p5), [#allocation12], 32   ;;  %p3929_p7 = pmov %p3928_p5 }
 0x118   : > { %p3930_p6 = pmov %p3928_p5 }
 0x119   : > { %3105 = vsyncadd (%p3929_p7), [#allocation12], 4294967264 }
 0x11a   : > { %3107 = dma.done.wait (%p3930_p6), [#allocation15], 32   ;;  %p3931_p9 = pmov %p3928_p5 }
 0x11b   : > { %p706_p4 = scmp.lt.s32.totalorder %s3268_s1, 1  ;;  %s3932_s3 = sld [smem:[#allocation24_spill]]  ;;  %vm714_vm0 = vcmask 261120   ;;  %v2755_v8 = vld [vmem:[%s3876_s6] sm:$0xff]   ;;  %v3141_v9 = vmov 0.0   ;;  %v2757_v11 = vld [vmem:[%s3876_s6 + $0x8] sm:$0xff]   ;;  %v958_v47 = vlaneseq }
 0x11c   : > { %3109 = vsyncadd (%p3931_p9), [#allocation15], 4294967264  ;;  %s3933_s4 = sld [smem:[#allocation28_spill]]  ;;  %2515 = vmatprep.subr.bf16.mxu0 %v3141_v9  ;;  %2523 = vmatprep.subr.bf16.mxu1 %v3141_v9  ;;  %vm3142_vm1 = vmmov 0   ;;  %v2430_v23 = vld [vmem:[#allocation5] ss:$0 sm:$0xff] }
 0x11d   : > { %s707_s5 = scalar_select %p706_p4, %s3268_s1, 1  ;;  %2524 = vmatpush3.bf16.msra.mxu1 %v2755_v8  ;;  %2519 = vmatprep.mubr.msk.bf16.mxu0 %vm3142_vm1, %v3141_v9  ;;  %v2758_v26 = vld [vmem:[#allocation10] sm:$0xff]   ;;  %v2759_v28 = vld [vmem:[#allocation10 + $0x8] sm:$0xff]   ;;  %v2435_v29 = vld [vmem:[#allocation8] ss:$0 sm:$0xff]  ;;  %v959_v51 = vshrl.u32 %v958_v47, 7 }
 0x11e   : > { %2525 = vmatprep.subr.bf16.mxu1 %v3141_v9  ;;  %2527 = vmatprep.mubr.msk.bf16.mxu1 %vm3142_vm1, %v3141_v9  ;;  %s3144_s22 = smov 120   ;;  %v2431_v39 = vld [vmem:[#allocation7] ss:$0 sm:$0xff]  ;;  %s3145_s24 = smov 112   ;;  %v3146_v45 = vmov 1983009808  }
 0x11f   : > { %s2428_s20 = sshll.u32 %s707_s5, 3  ;;  %v956_v46 = vunpack.c.l.s4 %v3146_v45  ;;  %v3147_v48 = vmov 1934713408   ;;  %vm1393_vm4 = vcmask 64512   ;;  %vm1639_vm6 = vcmask 1043456   ;;  %s3935_s16 = sld [smem:[#allocation31_spill]] }
 0x120   : > { %v988_v49 = vunpack.c.l.s4 %v3147_v48  ;;  %s3148_s5 = smov 16   ;;  %s3150_s19 = smov 24   ;;  %vm1970_vm7 = vcmask 130048   ;;  %vm1972_vm8 = vcmask 195584   ;;  %vm2186_vm11 = vcmask 523264  }
 0x121   : > { %s709_s17 = scalar_lea.vmem %s3932_s3, %s2428_s20  ;;  %2526 = vmatpush3.bf16.msra.mxu1 %v2757_v11  ;;  %s3934_s3 = sld [smem:[#allocation26_spill]]  ;;  %v957_v50 = vunpack.c.0.s8 %v956_v46 }
 0x122   : > { %v3580_v0 = vld [vmem:[%s709_s17] sm:$0xff]  ;;  %v2756_v10 = vld [vmem:[%s3933_s4 + $0x8] sm:$0xff]   ;;  %2539 = vmatprep.subr.bf16.mxu1 %v3141_v9  ;;  %s3143_s17 = smov 104   ;;  %v989_v54 = vunpack.c.0.s8 %v988_v49  ;;  %s3149_s20 = smov 8  }
 0x123   : > { %v715_v1 = vsel %vm714_vm0, %v3580_v0, 0.0  ;;  %v2754_v7 = vld [vmem:[%s3933_s4] sm:$0xff]   ;;  %v3630_v55 = vsub.s32 %v957_v50, %v959_v51  ;;  %s3937_s15 = sld [smem:[#allocation34_spill]]  ;;  %s2427_s0 = sshll.u32 %s3549_s7, 3 }
 0x124   : > { %716 = vadd.xlane.f32.xlu0 %v715_v1  ;;  %2516 = vmatpush3.bf16.msra.mxu0 %v2754_v7  ;;  %v3632_v61 = vsub.s32 %v989_v54, %v959_v51  ;;  %s705_s14 = scalar_lea.vmem [#allocation17], %s2427_s0  ;;  %p3941_p1 = scmp.ne.s32.totalorder %s3919_s10, 0 }
 0x125   : > { %2517 = vmatprep.subr.bf16.mxu0 %v3141_v9  ;;  %s3151_s18 = smov [#allocation17]  }
 0x127   : > { %v2429_v21 = vld [vmem:[%s3934_s3] ss:$0 sm:$0xff]  ;;  %s2246_s3 = sshll.u32 %s705_s14, 4  ;;  %s3827_s3 = int_to_ptr.vmem [resolvable:$true] %s2246_s3 }
 0x128   : > { %2518 = vmatpush3.bf16.msra.mxu0 %v2756_v10  ;;  %s3046_s0 = scalar_lea.vmem %s3827_s3, 128 }
 0x129   : > { %2531 = vmatprep.subr.bf16.mxu0 %v3141_v9  ;;  %p3047_p13 = scmp.ne.s32.totalorder %s3827_s3, %s3046_s0 }
 0x12b   : > { %p3048_p3 = pnand %p3047_p13, %p3941_p1 }
 0x12d   : > { %p3049_p2 = pneg %p3048_p3 }
 0x1b1   : > { %v717_v2 = vpop.xlane.xlu0 %716 }
 0x1b2   : > { %v719_v3 = vmul.f32 0.03125, %v717_v2 }
 0x1b4   : > { %v720_v4 = vsub.f32 %v3580_v0, %v719_v3 }
 0x1b6   : > { %v721_v5 = vmul.f32 %v720_v4, %v720_v4 }
 0x1b8   : > { %v722_v6 = vsel %vm714_vm0, %v721_v5, 0.0 }
 0x1b9   : > { %723 = vadd.xlane.f32.xlu0 %v722_v6 }
 0x246   : > { %v724_v12 = vpop.xlane.xlu0 %723 }
 0x247   : > { %v725_v13 = vmul.f32 0.032258064, %v724_v12 }
 0x249   : > { %2768 = vrsqrt.f32 %v725_v13  ;;  %vm728_vm2 = vcmp.eq.f32.partialorder %v725_v13, inf  ;;  %v731_v16 = vand.u32 2147483648, %v725_v13  ;;  %vm730_vm3 = vcmp.eq.f32.partialorder %v725_v13, 0.0 }
 0x253   : > { %v2769_v14 = vpop.eup %2768 }
 0x254   : > { %v727_v15 = vmul.f32 %v2769_v14, %v725_v13 }
 0x256   : > { %v729_v17 = vsel %vm728_vm2, %v725_v13, %v727_v15 }
 0x257   : > { %v732_v18 = vsel %vm730_vm3, %v731_v16, %v729_v17 }
 0x258   : > { %v733_v19 = vadd.f32 1e-06, %v732_v18 }
 0x25a   : > { %2770 = vrcp.f32 %v733_v19 }
 0x264   : > { %v2771_v20 = vpop.eup %2770 }
 0x265   : > { %v735_v22 = vmul.f32 %v2771_v20, %v720_v4 }
 0x267   : > { %v742_v24 = vmul.f32 %v2429_v21, %v735_v22 }
 0x269   : > { %v749_v25 = vadd.f32 %v2430_v23, %v742_v24 }
 0x26b   : > { %v750_v27 = vpack.c.bf16 %v749_v25, %v749_v25 }
 0x26d   : > { %2520 = vmatmul.mubr.msk.bf16.vlgmr.msra.gmra.mrb[0].mxu0 %vm714_vm0, %v750_v27  ;;  %2528 = vmatmul.mubr.msk.bf16.vlgmr.msra.gmra.mrb[0].mxu1 %vm714_vm0, %v750_v27 }
 0x26e   : > { %2532 = vmatpush3.bf16.msra.mxu0 %v2758_v26  ;;  %2535 = vmatprep.mubr.msk.bf16.mxu0 %vm3142_vm1, %v3141_v9 }
 0x26f   : > { %2533 = vmatprep.subr.bf16.mxu0 %v3141_v9  ;;  %2541 = vmatprep.mubr.msk.bf16.mxu1 %vm3142_vm1, %v3141_v9 }
 0x272   : > { %2534 = vmatpush3.bf16.msra.mxu0 %v2759_v28 }
 0x273   : > { %2545 = vmatprep.subr.bf16.mxu0 %v3141_v9 }
 0x275   : > { %2536 = vmatmul.mubr.msk.bf16.vlgmr.msra.gmra.mrb[4].mxu0 %vm714_vm0, %v750_v27 }
 0x276   : > { %2547 = vmatprep.mubr.msk.bf16.mxu0 %vm3142_vm1, %v3141_v9 }
 0x340   : > { %v811_v30 = vpop.f32.mrb[0].mxu0  ;;  %v874_v31 = vpop.f32.mrb[0].mxu1 }
 0x341   : > { %v875_v32 = vadd.f32 %v2435_v29, %v874_v31  ;;  %v2521_v33 = vpop.f32.mrb[1].mxu0  ;;  %v2529_v34 = vpop.f32.mrb[1].mxu1  ;;  %v812_v41 = vadd.f32 %v2431_v39, %v811_v30 }
 0x342   : > { %v814_v35 = vpop.f32.mrb[2].mxu0  ;;  %v877_v36 = vpop.f32.mrb[2].mxu1 }
 0x343   : > { %1100 = vrot.lane.b32.xlu0 %v875_v32, %s3143_s17  ;;  %1094 = vrot.lane.b32.xlu1 %v875_v32, %s3144_s22  ;;  %v2522_v37 = vpop.f32.mrb[3].mxu0  ;;  %v2530_v38 = vpop.f32.mrb[3].mxu1 }
 0x347   : > { %1097 = vrot.lane.b32.xlu1 %v875_v32, %s3145_s24 }
 0x348   : > { %v3625_v40 = vpop.f32.mrb[4].mxu0 }
 0x349   : > { %v2537_v42 = vpop.f32.mrb[5].mxu0 }
 0x34a   : > { %v940_v43 = vpop.f32.mrb[6].mxu0 }
 0x34b   : > { %944 = vrot.lane.b32.xlu1 %v812_v41, %s3144_s22  ;;  %v2538_v44 = vpop.f32.mrb[7].mxu0 }
 0x34f   : > { %947 = vrot.lane.b32.xlu1 %v812_v41, %s3145_s24 }
 0x353   : > { %950 = vrot.lane.b32.xlu1 %v812_v41, %s3143_s17 }
 0x3b5   : > { %v1101_v52 = vpop.permute.xlu0 %1100  ;;  %v1095_v53 = vpop.permute.xlu1 %1094 }
 0x3b6   : > { %v1119_v56 = vcombine.low %v1095_v53, %v1101_v52  ;;  %v1120_v57 = vcombine.high %v1095_v53, %v1101_v52 }
 0x3b8   : > { %v1127_v62 = vrot.slane %v1119_v56, %v3630_v55  ;;  %v1134_v63 = vrot.slane %v1120_v57, %v3630_v55 }
 0x3b9   : > { %v1098_v58 = vpop.permute.xlu1 %1097 }
 0x3ba   : > { %v1103_v59 = vcombine.low %v875_v32, %v1098_v58  ;;  %v1104_v60 = vcombine.high %v875_v32, %v1098_v58 }
 0x3bc   : > { %v1111_v1 = vrot.slane %v1103_v59, %v3630_v55  ;;  %v1118_v2 = vrot.slane %v1104_v60, %v3630_v55 }
 0x3bd   : > { %v945_v3 = vpop.permute.xlu1 %944 }
 0x3be   : > { %v1135_v4 = vcombine.low %v1111_v1, %v1127_v62  ;;  %v1136_v5 = vcombine.high %v1111_v1, %v1127_v62  ;;  %v1151_v6 = vcombine.low %v1118_v2, %v1134_v63  ;;  %v1152_v7 = vcombine.high %v1118_v2, %v1134_v63 }
 0x3c0   : > { %v1143_v8 = vrot.slane %v1135_v4, %v3632_v61  ;;  %v1150_v10 = vrot.slane %v1136_v5, %v3632_v61  ;;  %v1159_v11 = vrot.slane %v1151_v6, %v3632_v61  ;;  %v1166_v12 = vrot.slane %v1152_v7, %v3632_v61 }
 0x3c1   : > { %v948_v13 = vpop.permute.xlu1 %947 }
 0x3c2   : > { %v1171_v14 = vcombine.low %v1143_v8, %v1150_v10  ;;  %v2445_v15 = vcombine.high %v1143_v8, %v1150_v10  ;;  %v1187_v16 = vcombine.low %v1159_v11, %v1166_v12  ;;  %v2446_v17 = vcombine.high %v1159_v11, %v1166_v12 }
 0x3c3   : > { %v953_v18 = vcombine.low %v812_v41, %v948_v13  ;;  %v954_v19 = vcombine.high %v812_v41, %v948_v13 }
 0x3c4   : > { %v1178_v20 = vrot.slane %v1171_v14, %v3630_v55  ;;  %v1186_v21 = vrot.slane %v2445_v15, %v3630_v55  ;;  %v1194_v22 = vrot.slane %v1187_v16, %v3630_v55  ;;  %v1202_v23 = vrot.slane %v2446_v17, %v3630_v55 }
 0x3c5   : > { %v951_v24 = vpop.permute.xlu1 %950  ;;  %v961_v29 = vrot.slane %v953_v18, %v3630_v55  ;;  %v968_v30 = vrot.slane %v954_v19, %v3630_v55 }
 0x3c6   : > { %v969_v25 = vcombine.low %v945_v3, %v951_v24  ;;  %v970_v26 = vcombine.high %v945_v3, %v951_v24  ;;  %v1203_v27 = vcombine.low %v1178_v20, %v1186_v21  ;;  %v1219_v28 = vcombine.low %v1194_v22, %v1202_v23  ;;  %v1578_v24 = vld [vmem:[%s3553_s21] sm:$0x3]  ;;  %s3938_s21 = sld [smem:[#allocation33_spill]] }
 0x3c7   : > { %v1204_v35 = vcombine.high %v1178_v20, %v1186_v21  ;;  %v1220_v36 = vcombine.high %v1194_v22, %v1202_v23 }
 0x3c8   : > { %v977_v31 = vrot.slane %v969_v25, %v3630_v55  ;;  %v984_v32 = vrot.slane %v970_v26, %v3630_v55  ;;  %v1211_v33 = vrot.slane %v1203_v27, %v3632_v61  ;;  %v1227_v34 = vrot.slane %v1219_v28, %v3632_v61 }
 0x3c9   : > { %v1218_v50 = vrot.slane %v1204_v35, %v3632_v61  ;;  %v1234_v51 = vrot.slane %v1220_v36, %v3632_v61  ;;  %v1579_v25 = vunpack.c.0.s8 %v1578_v24 }
 0x3ca   : > { %v985_v37 = vcombine.low %v961_v29, %v977_v31  ;;  %v986_v38 = vcombine.high %v961_v29, %v977_v31  ;;  %v1001_v39 = vcombine.low %v968_v30, %v984_v32  ;;  %v1002_v41 = vcombine.high %v968_v30, %v984_v32 }
 0x3cb   : > { %v1235_v42 = vcombine.low %v1211_v33, %v1227_v34  ;;  %v1236_v43 = vcombine.high %v1211_v33, %v1227_v34  ;;  %v1237_v3 = vcombine.low %v1218_v50, %v1234_v51  ;;  %v1238_v4 = vcombine.high %v1218_v50, %v1234_v51 }
 0x3cc   : > { %v993_v44 = vrot.slane %v985_v37, %v3632_v61  ;;  %v1000_v45 = vrot.slane %v986_v38, %v3632_v61  ;;  %v1009_v46 = vrot.slane %v1001_v39, %v3632_v61  ;;  %v1016_v47 = vrot.slane %v1002_v41, %v3632_v61 }
 0x3cd   : > { %v1239_v48 = vpack.c.bf16 %v1235_v42, %v1235_v42  ;;  %v1240_v49 = vpack.c.bf16 %v1236_v43, %v1236_v43  ;;  %v1241_v12 = vpack.c.bf16 %v1237_v3, %v1237_v3  ;;  %v1242_v13 = vpack.c.bf16 %v1238_v4, %v1238_v4 }
 0x3ce   : > { %v1021_v52 = vcombine.low %v993_v44, %v1000_v45  ;;  %v2443_v53 = vcombine.high %v993_v44, %v1000_v45  ;;  %v1037_v54 = vcombine.low %v1009_v46, %v1016_v47  ;;  %v2444_v56 = vcombine.high %v1009_v46, %v1016_v47 }
 0x3cf   : > { %v1398_v57 = vsel %vm1393_vm4, %v1239_v48, 0  ;;  %v1444_v58 = vsel %vm1393_vm4, %v1240_v49, 0  ;;  %v1490_v18 = vsel %vm1393_vm4, %v1241_v12, 0  ;;  %v1536_v19 = vsel %vm1393_vm4, %v1242_v13, 0 }
 0x3d0   : > { %v1028_v59 = vrot.slane %v1021_v52, %v3630_v55  ;;  %v1036_v60 = vrot.slane %v2443_v53, %v3630_v55  ;;  %v1044_v62 = vrot.slane %v1037_v54, %v3630_v55  ;;  %v1052_v63 = vrot.slane %v2444_v56, %v3630_v55  ;;  %2540 = vmatpush3.bf16.xpose.msra.mxu1 %v1398_v57  ;;  %v2439_v52 = vld [vmem:[#allocation11] ss:$0 sm:$0xff] }
 0x3d1   : > { %2546 = vmatpush3.bf16.xpose.msra.mxu0 %v1444_v58  ;;  %2551 = vmatprep.subr.bf16.mxu1 %v3141_v9  ;;  %v1580_v26 = vcvt.s32.f32 %v1579_v25  ;;  %v938_v53 = vadd.f32 %v2439_v52, %v3625_v40 }
 0x3d2   : > { %v1053_v1 = vcombine.low %v1028_v59, %v1036_v60  ;;  %v1069_v2 = vcombine.low %v1044_v62, %v1052_v63  ;;  %2557 = vmatprep.subr.bf16.mxu0 %v3141_v9  ;;  %v1054_v5 = vcombine.high %v1028_v59, %v1036_v60  ;;  %v1070_v6 = vcombine.high %v1044_v62, %v1052_v63 }
 0x3d3   : > { %vm1581_vm5 = vcmp.ne.f32.partialorder %v1580_v26, 0.0 }
 0x3d4   : > { %v1061_v7 = vrot.slane %v1053_v1, %v3632_v61  ;;  %v1077_v8 = vrot.slane %v1069_v2, %v3632_v61  ;;  %v1068_v16 = vrot.slane %v1054_v5, %v3632_v61  ;;  %v1084_v17 = vrot.slane %v1070_v6, %v3632_v61 }
 0x3d6   : > { %v1085_v10 = vcombine.low %v1061_v7, %v1077_v8  ;;  %v1086_v11 = vcombine.high %v1061_v7, %v1077_v8  ;;  %v1087_v20 = vcombine.low %v1068_v16, %v1084_v17  ;;  %v1088_v21 = vcombine.high %v1068_v16, %v1084_v17 }
 0x3d8   : > { %v1089_v14 = vpack.c.bf16 %v1085_v10, %v1085_v10  ;;  %v1090_v15 = vpack.c.bf16 %v1086_v11, %v1086_v11  ;;  %v1091_v22 = vpack.c.bf16 %v1087_v20, %v1087_v20  ;;  %v1092_v23 = vpack.c.bf16 %v1088_v21, %v1088_v21 }
 0x3da   : > { %2542 = vmatmul.mubr.msk.bf16.vlgmr.msra.gmra.mrb[4].mxu1 %vm1393_vm4, %v1089_v14  ;;  %2548 = vmatmul.mubr.msk.bf16.vlgmr.msra.gmra.mrb[8].mxu0 %vm1393_vm4, %v1090_v15 }
 0x3db   : > { %2552 = vmatpush3.bf16.xpose.msra.mxu1 %v1490_v18  ;;  %2558 = vmatpush3.bf16.xpose.msra.mxu0 %v1536_v19 }
 0x3dc   : > { %2553 = vmatprep.mubr.msk.bf16.mxu1 %vm3142_vm1, %v3141_v9  ;;  %2559 = vmatprep.mubr.msk.bf16.mxu0 %vm3142_vm1, %v3141_v9 }
 0x3dd   : > { %2563 = vmatprep.subr.bf16.mxu1 %v3141_v9  ;;  %2569 = vmatprep.subr.bf16.mxu0 %v3141_v9 }
 0x3e2   : > { %2554 = vmatmul.mubr.msk.bf16.vlgmr.msra.gmra.mrb[8].mxu1 %vm1393_vm4, %v1091_v22  ;;  %2560 = vmatmul.mubr.msk.bf16.vlgmr.msra.gmra.mrb[12].mxu0 %vm1393_vm4, %v1092_v23 }
 0x3e3   : > { %2565 = vmatprep.mubr.msk.bf16.mxu1 %vm3142_vm1, %v3141_v9  ;;  %2571 = vmatprep.mubr.msk.bf16.mxu0 %vm3142_vm1, %v3141_v9 }
 0x4ad   : > { %v1434_v27 = vpop.f32.mrb[4].mxu1  ;;  %v1480_v28 = vpop.f32.mrb[8].mxu0 }
 0x4ae   : > { %v1584_v29 = vsel %vm1581_vm5, %v1434_v27, -1e+09  ;;  %v1585_v30 = vsel %vm1581_vm5, %v1480_v28, -1e+09  ;;  %v2543_v31 = vpop.f32.mrb[5].mxu1  ;;  %v2549_v32 = vpop.f32.mrb[9].mxu0 }
 0x4af   : > { %v1437_v33 = vpop.f32.mrb[6].mxu1  ;;  %v1483_v34 = vpop.f32.mrb[10].mxu0  ;;  %v1588_v35 = vsel %vm1393_vm4, %v1584_v29, -inf  ;;  %v1591_v36 = vsel %vm1393_vm4, %v1585_v30, -inf }
 0x4b0   : > { %1589 = vmax.xlane.f32.xlu1 %v1588_v35  ;;  %v2544_v37 = vpop.f32.mrb[7].mxu1  ;;  %1592 = vmax.xlane.f32.xlu0 %v1591_v36  ;;  %v2550_v38 = vpop.f32.mrb[11].mxu0 }
 0x4b5   : > { %v1526_v39 = vpop.f32.mrb[8].mxu1  ;;  %v1572_v41 = vpop.f32.mrb[12].mxu0 }
 0x4b6   : > { %v1586_v42 = vsel %vm1581_vm5, %v1526_v39, -1e+09  ;;  %v2555_v43 = vpop.f32.mrb[9].mxu1  ;;  %v2561_v44 = vpop.f32.mrb[13].mxu0  ;;  %v1587_v48 = vsel %vm1581_vm5, %v1572_v41, -1e+09 }
 0x4b7   : > { %v1529_v45 = vpop.f32.mrb[10].mxu1  ;;  %v1575_v46 = vpop.f32.mrb[14].mxu0  ;;  %v1594_v47 = vsel %vm1393_vm4, %v1586_v42, -inf  ;;  %v1597_v51 = vsel %vm1393_vm4, %v1587_v48, -inf }
 0x4b8   : > { %1595 = vmax.xlane.f32.xlu1 %v1594_v47  ;;  %v2556_v49 = vpop.f32.mrb[11].mxu1  ;;  %v2562_v50 = vpop.f32.mrb[15].mxu0 }
 0x4bc   : > { %1598 = vmax.xlane.f32.xlu1 %v1597_v51 }
 0x4cd   : > { %1247 = vrot.lane.b32.xlu1 %v938_v53, %s3145_s24 }
 0x53d   : > { %v1590_v54 = vpop.xlane.xlu1 %1589  ;;  %v1593_v56 = vpop.xlane.xlu0 %1592 }
 0x53e   : > { %v1600_v57 = vsub.f32 %v1584_v29, %v1590_v54  ;;  %v1601_v58 = vsub.f32 %v1585_v30, %v1593_v56 }
 0x540   : > { %v1604_v59 = vmul.f32 1.442695, %v1600_v57  ;;  %v1606_v60 = vmul.f32 1.442695, %v1601_v58 }
 0x542   : > { %2772 = vpow2.f32 %v1604_v59 }
 0x543   : > { %2774 = vpow2.f32 %v1606_v60 }
 0x545   : > { %v1596_v2 = vpop.xlane.xlu1 %1595 }
 0x546   : > { %v1602_v4 = vsub.f32 %v1586_v42, %v1596_v2 }
 0x548   : > { %v1608_v6 = vmul.f32 1.442695, %v1602_v4 }
 0x549   : > { %v1599_v3 = vpop.xlane.xlu1 %1598 }
 0x54a   : > { %v1603_v5 = vsub.f32 %v1587_v48, %v1599_v3  ;;  %2776 = vpow2.f32 %v1608_v6 }
 0x54c   : > { %v3697_v62 = vpop.eup %2772  ;;  %v1610_v7 = vmul.f32 1.442695, %v1603_v5 }
 0x54d   : > { %v3699_v63 = vpop.eup %2774  ;;  %v1612_v1 = vsel %vm1393_vm4, %v3697_v62, 0.0  ;;  %v1248_v13 = vpop.permute.xlu1 %1247 }
 0x54e   : > { %1613 = vadd.xlane.f32.xlu0 %v1612_v1  ;;  %v1615_v40 = vsel %vm1393_vm4, %v3699_v63, 0.0  ;;  %2778 = vpow2.f32 %v1610_v7  ;;  %v1253_v16 = vcombine.low %v938_v53, %v1248_v13  ;;  %v1254_v17 = vcombine.high %v938_v53, %v1248_v13 }
 0x54f   : > { %1616 = vadd.xlane.f32.xlu1 %v1615_v40 }
 0x550   : > { %v1261_v22 = vrot.slane %v1253_v16, %v3630_v55  ;;  %v1268_v23 = vrot.slane %v1254_v17, %v3630_v55 }
 0x554   : > { %v3707_v8 = vpop.eup %2776 }
 0x555   : > { %v1618_v11 = vsel %vm1393_vm4, %v3707_v8, 0.0 }
 0x558   : > { %v3709_v10 = vpop.eup %2778 }
 0x559   : > { %v1621_v12 = vsel %vm1393_vm4, %v3709_v10, 0.0 }
 0x560   : > { %1250 = vrot.lane.b32.xlu1 %v938_v53, %s3143_s17  ;;  %s3936_s17 = sld [smem:[#allocation32_spill]] }
 0x564   : > { %1244 = vrot.lane.b32.xlu0 %v938_v53, %s3144_s22 }
 0x583   : > { %1619 = vadd.xlane.f32.xlu0 %v1618_v11 }
 0x584   : > { %1622 = vadd.xlane.f32.xlu1 %v1621_v12 }
 0x5db   : > { %v1614_v14 = vpop.xlane.xlu0 %1613 }
 0x5dc   : > { %v1617_v15 = vpop.xlane.xlu1 %1616  ;;  %2780 = vrcp.f32 %v1614_v14 }
 0x5dd   : > { %2782 = vrcp.f32 %v1617_v15 }
 0x5df   : > { %v1245_v18 = vpop.permute.xlu0 %1244 }
 0x5e0   : > { %v1251_v19 = vpop.permute.xlu1 %1250 }
 0x5e1   : > { %v1269_v20 = vcombine.low %v1245_v18, %v1251_v19  ;;  %v1270_v21 = vcombine.high %v1245_v18, %v1251_v19  ;;  %v2760_v18 = vld [vmem:[%s3935_s16] sm:$0xff]  }
 0x5e3   : > { %v1277_v24 = vrot.slane %v1269_v20, %v3630_v55  ;;  %v1284_v25 = vrot.slane %v1270_v21, %v3630_v55 }
 0x5e5   : > { %v1285_v26 = vcombine.low %v1261_v22, %v1277_v24  ;;  %v1286_v27 = vcombine.high %v1261_v22, %v1277_v24  ;;  %v1301_v28 = vcombine.low %v1268_v23, %v1284_v25  ;;  %v1302_v29 = vcombine.high %v1268_v23, %v1284_v25 }
 0x5e6   : > { %v2781_v49 = vpop.eup %2780 }
 0x5e7   : > { %v1293_v30 = vrot.slane %v1285_v26, %v3632_v61  ;;  %v1300_v31 = vrot.slane %v1286_v27, %v3632_v61  ;;  %v1309_v32 = vrot.slane %v1301_v28, %v3632_v61  ;;  %v1316_v33 = vrot.slane %v1302_v29, %v3632_v61  ;;  %v2783_v52 = vpop.eup %2782 }
 0x5e8   : > { %v1628_v58 = vmul.f32 %v2781_v49, %v3697_v62  ;;  %v1629_v59 = vmul.f32 %v2783_v52, %v3699_v63 }
 0x5e9   : > { %v1321_v34 = vcombine.low %v1293_v30, %v1300_v31  ;;  %v2447_v35 = vcombine.high %v1293_v30, %v1300_v31  ;;  %v1337_v36 = vcombine.low %v1309_v32, %v1316_v33  ;;  %v2448_v37 = vcombine.high %v1309_v32, %v1316_v33 }
 0x5ea   : > { %v1632_v5 = vpack.c.bf16 %v1628_v58, %v1628_v58  ;;  %v1633_v6 = vpack.c.bf16 %v1629_v59, %v1629_v59 }
 0x5eb   : > { %v1328_v38 = vrot.slane %v1321_v34, %v3630_v55  ;;  %v1336_v39 = vrot.slane %v2447_v35, %v3630_v55  ;;  %v1344_v41 = vrot.slane %v1337_v36, %v3630_v55  ;;  %v1352_v42 = vrot.slane %v2448_v37, %v3630_v55 }
 0x5ed   : > { %v1353_v43 = vcombine.low %v1328_v38, %v1336_v39  ;;  %v1354_v44 = vcombine.high %v1328_v38, %v1336_v39  ;;  %v1369_v45 = vcombine.low %v1344_v41, %v1352_v42  ;;  %v1370_v46 = vcombine.high %v1344_v41, %v1352_v42 }
 0x5ef   : > { %v1361_v47 = vrot.slane %v1353_v43, %v3632_v61  ;;  %v1368_v48 = vrot.slane %v1354_v44, %v3632_v61  ;;  %v1377_v50 = vrot.slane %v1369_v45, %v3632_v61  ;;  %v1384_v51 = vrot.slane %v1370_v46, %v3632_v61  ;;  %v2761_v46 = vld [vmem:[%s3935_s16 + $0x8] sm:$0xff]  }
 0x5f1   : > { %v1385_v53 = vcombine.low %v1361_v47, %v1377_v50  ;;  %v1386_v54 = vcombine.high %v1361_v47, %v1377_v50  ;;  %v1387_v56 = vcombine.low %v1368_v48, %v1384_v51  ;;  %v1388_v57 = vcombine.high %v1368_v48, %v1384_v51 }
 0x5f3   : > { %v1389_v60 = vpack.c.bf16 %v1385_v53, %v1385_v53  ;;  %v1390_v1 = vpack.c.bf16 %v1386_v54, %v1386_v54  ;;  %v1391_v3 = vpack.c.bf16 %v1387_v56, %v1387_v56  ;;  %v1392_v4 = vpack.c.bf16 %v1388_v57, %v1388_v57 }
 0x5f5   : > { %v1641_v40 = vsel %vm1639_vm6, %v1389_v60, 0  ;;  %v1687_v2 = vsel %vm1639_vm6, %v1390_v1, 0  ;;  %v1733_v62 = vsel %vm1639_vm6, %v1391_v3, 0  ;;  %v1779_v63 = vsel %vm1639_vm6, %v1392_v4, 0 }
 0x5f6   : > { %2564 = vmatpush3.bf16.msra.mxu1 %v1641_v40  ;;  %2570 = vmatpush3.bf16.msra.mxu0 %v1687_v2 }
 0x5f7   : > { %2575 = vmatprep.subr.bf16.mxu1 %v3141_v9  ;;  %2581 = vmatprep.subr.bf16.mxu0 %v3141_v9 }
 0x5f9   : > { %2566 = vmatmul.mubr.msk.bf16.vlgmr.msra.gmra.mrb[12].mxu1 %vm1393_vm4, %v1632_v5  ;;  %2572 = vmatmul.mubr.msk.bf16.vlgmr.msra.gmra.mrb[16].mxu0 %vm1393_vm4, %v1633_v6 }
 0x5fa   : > { %2576 = vmatpush3.bf16.msra.mxu1 %v1733_v62  ;;  %2582 = vmatpush3.bf16.msra.mxu0 %v1779_v63 }
 0x5fb   : > { %2577 = vmatprep.mubr.msk.bf16.mxu1 %vm3142_vm1, %v3141_v9  ;;  %2583 = vmatprep.mubr.msk.bf16.mxu0 %vm3142_vm1, %v3141_v9 }
 0x5fc   : > { %2587 = vmatprep.subr.bf16.mxu1 %v3141_v9  ;;  %2595 = vmatprep.subr.bf16.mxu0 %v3141_v9 }
 0x610   : > { %v1620_v7 = vpop.xlane.xlu0 %1619 }
 0x611   : > { %2784 = vrcp.f32 %v1620_v7  ;;  %v1623_v11 = vpop.xlane.xlu1 %1622 }
 0x612   : > { %2786 = vrcp.f32 %v1623_v11 }
 0x61b   : > { %v2785_v12 = vpop.eup %2784 }
 0x61c   : > { %v2787_v13 = vpop.eup %2786  ;;  %v1630_v14 = vmul.f32 %v2785_v12, %v3707_v8 }
 0x61d   : > { %v1631_v15 = vmul.f32 %v2787_v13, %v3709_v10 }
 0x61e   : > { %v1634_v16 = vpack.c.bf16 %v1630_v14, %v1630_v14 }
 0x61f   : > { %v1635_v17 = vpack.c.bf16 %v1631_v15, %v1631_v15 }
 0x620   : > { %2578 = vmatmul.mubr.msk.bf16.vlgmr.msra.gmra.mrb[16].mxu1 %vm1393_vm4, %v1634_v16 }
 0x621   : > { %2584 = vmatmul.mubr.msk.bf16.vlgmr.msra.gmra.mrb[20].mxu0 %vm1393_vm4, %v1635_v17  ;;  %2591 = vmatprep.mubr.msk.bf16.mxu1 %vm3142_vm1, %v3141_v9  ;;  %v2459_v17 = vld [vmem:[#allocation13] ss:$0 sm:$0xff] }
 0x622   : > { %2599 = vmatprep.mubr.msk.bf16.mxu0 %vm3142_vm1, %v3141_v9  ;;  %2588 = vmatpush3.bf16.msra.mxu1 %v2760_v18 }
 0x623   : > { %2589 = vmatprep.subr.bf16.mxu1 %v3141_v9 }
 0x626   : > { %2590 = vmatpush3.bf16.msra.mxu1 %v2761_v46 }
 0x627   : > { %2603 = vmatprep.subr.bf16.mxu1 %v3141_v9 }
 0x6cc   : > { %v1677_v8 = vpop.f32.mrb[12].mxu1  ;;  %v1723_v10 = vpop.f32.mrb[16].mxu0 }
 0x6cd   : > { %v2567_v19 = vpop.f32.mrb[13].mxu1  ;;  %v2573_v20 = vpop.f32.mrb[17].mxu0 }
 0x6ce   : > { %v1680_v21 = vpop.f32.mrb[14].mxu1  ;;  %v1726_v22 = vpop.f32.mrb[18].mxu0 }
 0x6cf   : > { %v2568_v23 = vpop.f32.mrb[15].mxu1  ;;  %v2574_v24 = vpop.f32.mrb[19].mxu0 }
 0x6f3   : > { %v1769_v25 = vpop.f32.mrb[16].mxu1 }
 0x6f4   : > { %v1821_v26 = vcombine.low %v1677_v8, %v1769_v25  ;;  %v1822_v27 = vcombine.high %v1677_v8, %v1769_v25  ;;  %v1815_v28 = vpop.f32.mrb[20].mxu0  ;;  %v2579_v29 = vpop.f32.mrb[17].mxu1 }
 0x6f5   : > { %v1837_v30 = vcombine.low %v1723_v10, %v1815_v28  ;;  %v1838_v31 = vcombine.high %v1723_v10, %v1815_v28  ;;  %v2585_v32 = vpop.f32.mrb[21].mxu0  ;;  %v1772_v33 = vpop.f32.mrb[18].mxu1  ;;  %v2762_v28 = vld [vmem:[%s3936_s17] sm:$0xff]  }
 0x6f6   : > { %v1829_v34 = vrot.slane %v1821_v26, %v3630_v55  ;;  %v1836_v35 = vrot.slane %v1822_v27, %v3630_v55  ;;  %v1818_v36 = vpop.f32.mrb[22].mxu0  ;;  %v2580_v37 = vpop.f32.mrb[19].mxu1  ;;  %2596 = vmatpush3.bf16.msra.mxu0 %v2762_v28  ;;  %v2764_v29 = vld [vmem:[%s3937_s15] sm:$0xff]  }
 0x6f7   : > { %v1845_v38 = vrot.slane %v1837_v30, %v3630_v55  ;;  %v1852_v39 = vrot.slane %v1838_v31, %v3630_v55  ;;  %v2586_v41 = vpop.f32.mrb[23].mxu0  ;;  %2597 = vmatprep.subr.bf16.mxu0 %v3141_v9  ;;  %v2765_v30 = vld [vmem:[%s3937_s15 + $0x8] sm:$0xff]  }
 0x6f8   : > { %v2463_v41 = vld [vmem:[#allocation14] ss:$0 sm:$0xff] }
 0x6f9   : > { %v1853_v42 = vcombine.low %v1829_v34, %v1845_v38  ;;  %v1854_v43 = vcombine.high %v1829_v34, %v1845_v38  ;;  %v1869_v44 = vcombine.low %v1836_v35, %v1852_v39  ;;  %v1870_v45 = vcombine.high %v1836_v35, %v1852_v39 }
 0x6fb   : > { %v1861_v47 = vrot.slane %v1853_v42, %v3632_v61  ;;  %v1868_v48 = vrot.slane %v1854_v43, %v3632_v61  ;;  %v1877_v49 = vrot.slane %v1869_v44, %v3632_v61  ;;  %v1884_v50 = vrot.slane %v1870_v45, %v3632_v61  ;;  %v2464_v43 = vld [vmem:[#allocation16] ss:$0 sm:$0xff] }
 0x6fd   : > { %v1889_v51 = vcombine.low %v1861_v47, %v1868_v48  ;;  %v2457_v52 = vcombine.high %v1861_v47, %v1868_v48  ;;  %v1905_v53 = vcombine.low %v1877_v49, %v1884_v50  ;;  %v2458_v54 = vcombine.high %v1877_v49, %v1884_v50  ;;  %v2766_v47 = vld [vmem:[%s3937_s15 + $0x10] sm:$0xff]   ;;  %v2767_v48 = vld [vmem:[%s3937_s15 + $0x18] sm:$0xff]   ;;  %v2465_v49 = vld [vmem:[%s3938_s21] ss:$0 sm:$0xff]  ;;  %s3940_s21 = sld [smem:[#allocation36_spill]] }
 0x6ff   : > { %v1896_v56 = vrot.slane %v1889_v51, %v3630_v55  ;;  %v1904_v57 = vrot.slane %v2457_v52, %v3630_v55  ;;  %v1912_v58 = vrot.slane %v1905_v53, %v3630_v55  ;;  %v1920_v59 = vrot.slane %v2458_v54, %v3630_v55 }
 0x701   : > { %v1922_v60 = vcombine.high %v1896_v56, %v1904_v57  ;;  %v1938_v1 = vcombine.high %v1912_v58, %v1920_v59  ;;  %v1921_v40 = vcombine.low %v1896_v56, %v1904_v57  ;;  %v1937_v2 = vcombine.low %v1912_v58, %v1920_v59 }
 0x703   : > { %v1936_v3 = vrot.slane %v1922_v60, %v3632_v61  ;;  %v1952_v4 = vrot.slane %v1938_v1, %v3632_v61  ;;  %v1929_v5 = vrot.slane %v1921_v40, %v3632_v61  ;;  %v1945_v6 = vrot.slane %v1937_v2, %v3632_v61 }
 0x705   : > { %v1955_v62 = vcombine.low %v1936_v3, %v1952_v4  ;;  %v1954_v63 = vcombine.high %v1929_v5, %v1945_v6  ;;  %v1956_v7 = vcombine.high %v1936_v3, %v1952_v4  ;;  %v1953_v11 = vcombine.low %v1929_v5, %v1945_v6 }
 0x707   : > { %1962 = vrot.lane.b32.xlu1 %v1955_v62, %s3148_s5  ;;  %1958 = vrot.lane.b32.xlu0 %v1954_v63, %s3149_s20  ;;  %s3939_s20 = sld [smem:[#allocation35_spill]]  ;;  %s3050_s5 = sshll.u32 %s3151_s18, 4  ;;  %s3051_s5 = int_to_ptr.vmem [resolvable:$false] %s3050_s5 }
 0x708   : > { %p3053_p0 = scmp.lt.s32.totalorder %s3827_s3, %s3051_s5 }
 0x70b   : > { %1966 = vrot.lane.b32.xlu0 %v1956_v7, %s3150_s19  ;;  %s2476_s19 = sshll.u32 %s3268_s1, 7  ;;  %s2233_s1 = scalar_lea.sflag [#allocation4], %s3549_s7 }
 0x70c   : > { %s3825_s4 = scalar_lea.hbm %s3940_s21, %s2476_s19 }
 0x779   : > { %v1959_v55 = vpop.permute.xlu0 %1958  ;;  %v1963_v12 = vpop.permute.xlu1 %1962 }
 0x77a   : > { %v1969_v13 = vsel %vm1393_vm4, %v1953_v11, %v1959_v55 }
 0x77b   : > { %v1971_v15 = vsel %vm1970_vm7, %v1969_v13, %v1963_v12 }
 0x77d   : > { %v1967_v14 = vpop.permute.xlu0 %1966 }
 0x77e   : > { %v1973_v16 = vsel %vm1972_vm8, %v1971_v15, %v1967_v14 }
 0x77f   : > { %v1974_v61 = vpack.c.bf16 %v1973_v16, %v1973_v16 }
 0x781   : > { %2592 = vmatmul.mubr.msk.bf16.vlgmr.msra.gmra.mrb[20].mxu1 %vm714_vm0, %v1974_v61 }
 0x782   : > { %2611 = vmatprep.mubr.msk.bf16.mxu1 %vm3142_vm1, %v3141_v9  ;;  %2604 = vmatpush3.bf16.msra.mxu1 %v2764_v29 }
 0x783   : > { %2605 = vmatprep.subr.bf16.mxu1 %v3141_v9 }
 0x786   : > { %2606 = vmatpush3.bf16.msra.mxu1 %v2765_v30 }
 0x787   : > { %2607 = vmatprep.subr.bf16.mxu1 %v3141_v9 }
 0x78a   : > { %2608 = vmatpush3.bf16.msra.mxu1 %v2766_v47 }
 0x78b   : > { %2609 = vmatprep.subr.bf16.mxu1 %v3141_v9  ;;  %v2469_v9 = vld [vmem:[%s3939_s20] ss:$0 sm:$0xff]  ;;  %s3052_s20 = scalar_lea.vmem %s3051_s5, 256 }
 0x78c   : > { %p3054_p10 = scmp.lt.s32.totalorder %s3052_s20, %s3046_s0 }
 0x78e   : > { %2610 = vmatpush3.bf16.msra.mxu1 %v2767_v48  ;;  %p3055_p11 = por %p3054_p10, %p3053_p0 }
 0x790   : > { %p3056_p12 = pnand %p3055_p11, %p3049_p2 }
 0x854   : > { %v2035_v18 = vpop.f32.mrb[20].mxu1 }
 0x855   : > { %v2036_v8 = vadd.f32 %v2459_v17, %v2035_v18  ;;  %v2593_v10 = vpop.f32.mrb[21].mxu1 }
 0x856   : > { %v2038_v19 = vpop.f32.mrb[22].mxu1 }
 0x857   : > { %v3784_v20 = vadd.f32 %v2036_v8, %v3580_v0  ;;  %v2594_v21 = vpop.f32.mrb[23].mxu1  ;;  %v2763_v0 = vld [vmem:[%s3936_s17 + $0x8] sm:$0xff]  }
 0x858   : > { %2598 = vmatpush3.bf16.msra.mxu0 %v2763_v0 }
 0x859   : > { %v2044_v22 = vsel %vm714_vm0, %v3784_v20, 0.0 }
 0x85a   : > { %2045 = vadd.xlane.f32.xlu1 %v2044_v22 }
 0x8e7   : > { %v2046_v23 = vpop.xlane.xlu1 %2045 }
 0x8e8   : > { %v2047_v24 = vmul.f32 0.03125, %v2046_v23 }
 0x8ea   : > { %v2048_v25 = vsub.f32 %v3784_v20, %v2047_v24 }
 0x8ec   : > { %v2049_v26 = vmul.f32 %v2048_v25, %v2048_v25 }
 0x8ee   : > { %v2050_v27 = vsel %vm714_vm0, %v2049_v26, 0.0 }
 0x8ef   : > { %2051 = vadd.xlane.f32.xlu0 %v2050_v27 }
 0x97c   : > { %v2052_v31 = vpop.xlane.xlu0 %2051 }
 0x97d   : > { %v2053_v32 = vmul.f32 0.032258064, %v2052_v31 }
 0x97f   : > { %2788 = vrsqrt.f32 %v2053_v32  ;;  %vm2056_vm9 = vcmp.eq.f32.partialorder %v2053_v32, inf  ;;  %v2059_v35 = vand.u32 2147483648, %v2053_v32  ;;  %vm2058_vm10 = vcmp.eq.f32.partialorder %v2053_v32, 0.0 }
 0x989   : > { %v2789_v33 = vpop.eup %2788 }
 0x98a   : > { %v2055_v34 = vmul.f32 %v2789_v33, %v2053_v32 }
 0x98c   : > { %v2057_v36 = vsel %vm2056_vm9, %v2053_v32, %v2055_v34 }
 0x98d   : > { %v2060_v37 = vsel %vm2058_vm10, %v2059_v35, %v2057_v36 }
 0x98e   : > { %v2061_v38 = vadd.f32 1e-06, %v2060_v37 }
 0x990   : > { %2790 = vrcp.f32 %v2061_v38 }
 0x99a   : > { %v2791_v39 = vpop.eup %2790 }
 0x99b   : > { %v2063_v42 = vmul.f32 %v2791_v39, %v2048_v25 }
 0x99d   : > { %v2070_v44 = vmul.f32 %v2463_v41, %v2063_v42 }
 0x99f   : > { %v2077_v45 = vadd.f32 %v2464_v43, %v2070_v44 }
 0x9a1   : > { %v2078_v46 = vpack.c.bf16 %v2077_v45, %v2077_v45 }
 0x9a3   : > { %2600 = vmatmul.mubr.msk.bf16.vlgmr.msra.gmra.mrb[24].mxu0 %vm714_vm0, %v2078_v46 }
 0xa76   : > { %v2139_v50 = vpop.f32.mrb[24].mxu0 }
 0xa77   : > { %v2140_v51 = vadd.f32 %v2465_v49, %v2139_v50  ;;  %v2601_v52 = vpop.f32.mrb[25].mxu0 }
 0xa78   : > { %v2142_v53 = vpop.f32.mrb[26].mxu0 }
 0xa79   : > { %v2145_v54 = vmax.f32 %v2140_v51, 0.0  ;;  %v2602_v56 = vpop.f32.mrb[27].mxu0 }
 0xa7b   : > { %v2146_v57 = vpack.c.bf16 %v2145_v54, %v2145_v54 }
 0xa7d   : > { %2612 = vmatmul.mubr.msk.bf16.vlgmr.msra.gmra.mrb[24].mxu1 %vm2186_vm11, %v2146_v57 }
 0xb50   : > { %v2224_v58 = vpop.f32.mrb[24].mxu1 }
 0xb51   : > { %v2225_v59 = vadd.f32 %v2469_v9, %v2224_v58  ;;  %v2613_v60 = vpop.f32.mrb[25].mxu1 }
 0xb52   : > { %v2227_v1 = vpop.f32.mrb[26].mxu1 }
 0xb53   : > { %v2230_v40 = vadd.f32 %v2225_v59, %v3784_v20  ;;  %v2614_v2 = vpop.f32.mrb[27].mxu1 }
 0xb55   : > { %2231 = vst.msk [vmem:[%s705_s14] sm:$0xff] %vm714_vm0, %v2230_v40 }
 0xb56   : > { %3059 = shalt.err (!%p3056_p12)
}
 0xb57   : > { %s3060_s7 = scalar_lea.hbm %s3825_s4, 128  ;;  %s3064_s22 = scalar_lea.hbm %s3940_s21, 256 }
 0xb58   : > { %p3061_p8 = scmp.ne.s32.totalorder %s3825_s4, %s3060_s7  ;;  %p3065_p6 = scmp.lt.u32.totalorder %s3825_s4, %s3940_s21 }
 0xb59   : > { %p3066_p9 = scmp.lt.u32.totalorder %s3064_s22, %s3060_s7  ;;  %p3068_p13 = scmp.lt.u32.totalorder %s3060_s7, %s3825_s4 }
 0xb5a   : > { %p3062_p5 = pnand %p3061_p8, %p3941_p1 }
 0xb5b   : > { %p3067_p4 = por %p3066_p9, %p3065_p6 }
 0xb5c   : > { %p3063_p7 = pneg %p3062_p5 }
 0xb5d   : > { %p3069_p3 = por %p3068_p13, %p3067_p4 }
 0xb5f   : > { %p3070_p2 = pnand %p3069_p3, %p3063_p7 }
 0xb61   : > { %3073 = shalt.err (!%p3070_p2)
}
 0xb62   : > { %2649 = dma.vmem_to_hbm [thread:$0]  (%p3941_p1), %s3827_s3, 128, %s3825_s4, %s2233_s1  }
 0xb63 PF: > { %s2258_s0 = sand.u32 1, %s3116_s27   ;;  %p3942_p0 = scmp.ne.s32.totalorder %s3920_s23, 0 }
 0xb64   : > { %p3943_p10 = scmp.ge.s32.totalorder %s3128_s30, 2  ;;  %s2259_s5 = scalar_lea.sflag [#allocation4], %s2258_s0 }
 0xb66   : > { %p2681_p11 = pnand %p3943_p10, %p3942_p0 }
 0xb68   : > { %3111 = dma.done.wait (!%p2681_p11), %s2259_s5, 128  }
 0xb69   : > { %3113 = vsyncadd (!%p2681_p11), %s2259_s5, 4294967168  ;;  %p35_p12 = scmp.ge.s32.totalorder %s3473_s2, 4   ;;  %s3944_s27 = smov %s3120_s28 }
 0xb6a   : > { %s3945_s28 = smov %s3124_s29  ;;  %s3946_s29 = smov %s3484_s25 }
 0xb6b   : > { %s3947_s30 = smov %s3473_s2  ;;  %37 = sbr.rel (!%p35_p12) target bundleno = 23 (0x17), region = 172 }
 0xb72   :  { %2264 = vsyncpa [#allocation3], 1 }
 0xb73   :  { %2266 = vsyncpa [#allocation3 + $0x1], 1 }
 0xb74   :  { %2267 = vsyncpa [#allocation6], 1 }
 0xb75   :  { %2268 = vsyncpa [#allocation9], 1 }
 0xb76   :  { %2269 = vsyncpa [#allocation12], 1 }
 0xb77   :  { %2270 = vsyncpa [#allocation15], 1 }
 0xb78   :  { %2271 = vsyncpa [#allocation4], 1 }
 0xb79   :  { %2273 = vsyncpa [#allocation4 + $0x1], 1 }

</bundles_post_ra>
